<compile_context>
chip_gen: v7x
topology: tpu7x:2x2x1
jax: 0.10.0
libtpu: 0.0.40
codegen_flags: <defaults>
</compile_context>

<pallas_src>
import math
from functools import partial

import jax
import jax.numpy as jnp
from jax.experimental import pallas as pl
from jax.experimental.pallas import tpu as pltpu

# ---------------- small synthetic bert-base-style config ----------------
VOCAB = 50
TYPE_VOCAB = 2
MAX_POS = 16
HIDDEN = 32            # stands in for 768
NUM_HEADS = 4
HEAD_DIM = HIDDEN // NUM_HEADS
INTERMEDIATE = 64
NUM_LAYERS = 2
NUM_LABELS = 2
NUM_LABELS_PAD = 128   # lane-dense logits slab; real logits are the first 2 cols
NEG_PAD = -1e30        # pad-column bias -> exp() == 0, logsumexp unaffected
LN_EPS = 1e-12
CROSS_BATCH_MASK = -1e9


# ---------------- in-kernel helpers (traced inside the pallas body) ----------------
def _layernorm(x, g, b):
    mean = jnp.mean(x, axis=-1, keepdims=True)
    cen = x - mean
    var = jnp.mean(cen * cen, axis=-1, keepdims=True)
    return cen * jax.lax.rsqrt(var + LN_EPS) * g + b


def _gelu(x):
    # TODO(synk): HF BERT uses exact erf-GELU; tanh approximation used here.
    return 0.5 * x * (1.0 + jnp.tanh(0.7978845608028654 * (x + 0.044715 * x * x * x)))


# ---------------- the single fused kernel ----------------
def _bert_forward_kernel(emb_ref, mask_ref, lw_ref, lv_ref, hw_ref, hv_ref, onehot_ref,
                         hs_ref, logits_ref, loss_ref, *,
                         num_layers, num_heads, head_dim, hidden, inter,
                         batch, seq, scale, compute_loss):
    """Embedding LN -> NUM_LAYERS encoder layers -> pooler -> classifier -> CE.

    All activations stay in VMEM; matmuls take bf16 inputs with f32 MXU
    accumulation; LayerNorm / GELU / softmax stay f32 on the VPU/EUP.
    """
    H, I = hidden, inter
    tokens = batch * seq

    # ---- packed "head" (non-layer) vectors: (2, 128) f32 ----
    hv = hv_ref[...]
    emb_g = hv[0:1, 0:H]
    emb_b = hv[0:1, H:2 * H]
    pooler_b = hv[0:1, 2 * H:3 * H]
    cls_b = hv[1:2, :]                                    # (1, 128) NEG_PAD-padded bias

    # ---- embedding LayerNorm (fused; no standalone launch / HBM round-trip) ----
    h = _layernorm(emb_ref[...], emb_g, emb_b)            # (T, H) f32
    hs_ref[0] = h

    amask = mask_ref[...]                                 # (T, T) additive block-diag mask

    # ---- encoder layers (static unrolled loop; weights indexed by layer axis) ----
    for l in range(num_layers):
        lw = lw_ref[l]                                    # (H, 4H+2I) bf16 weight slab
        lv = lv_ref[l]                                    # (3, 128)  f32 vector slab
        wqkv = lw[:, 0:3 * H]                             # (H, 3H)
        wo = lw[:, 3 * H:4 * H]                           # (H, H)
        w1 = lw[:, 4 * H:4 * H + I]                       # (H, I)
        w2t = lw[:, 4 * H + I:4 * H + 2 * I]              # (H, I)  == W2^T
        bqkv = lv[0:1, 0:3 * H]
        bo = lv[1:2, 0:H]
        ln1_g = lv[1:2, H:2 * H]
        ln1_b = lv[1:2, 2 * H:3 * H]
        b2 = lv[1:2, 3 * H:4 * H]
        b1 = lv[2:3, 0:I]
        ln2_g = lv[2:3, I:I + H]
        ln2_b = lv[2:3, I + H:I + 2 * H]

        xb = h.astype(jnp.bfloat16)                       # one cast per layer
        qkv = jnp.dot(xb, wqkv, preferred_element_type=jnp.float32) + bqkv   # (T, 3H)
        qkvb = qkv.astype(jnp.bfloat16)                   # one cast for all heads

        # per-head masked attention over the full token axis (batch folded in
        # via the block-diagonal mask); Wo applied per head-block and summed.
        attn = jnp.zeros((tokens, H), jnp.float32)
        for hd in range(num_heads):
            lo = hd * head_dim
            hi = lo + head_dim
            q = qkvb[:, lo:hi]                            # (T, Dh) bf16
            k = qkvb[:, H + lo:H + hi]
            v = qkvb[:, 2 * H + lo:2 * H + hi]
            s = jax.lax.dot_general(q, k, (((1,), (1,)), ((), ())),
                                    preferred_element_type=jnp.float32) * scale + amask
            m = jnp.max(s, axis=-1, keepdims=True)
            p = jnp.exp(s - m)
            p = p * pl.reciprocal(jnp.sum(p, axis=-1, keepdims=True), approx=True)
            ctx = jnp.dot(p.astype(jnp.bfloat16), v,
                          preferred_element_type=jnp.float32)               # (T, Dh)
            attn = attn + jnp.dot(ctx.astype(jnp.bfloat16), wo[lo:hi, :],
                                  preferred_element_type=jnp.float32)
        attn = attn + bo

        h1 = _layernorm(attn + h, ln1_g, ln1_b)

        mid = jnp.dot(h1.astype(jnp.bfloat16), w1,
                      preferred_element_type=jnp.float32) + b1              # (T, I)
        mid = _gelu(mid)
        ffn = jax.lax.dot_general(mid.astype(jnp.bfloat16), w2t,
                                  (((1,), (1,)), ((), ())),
                                  preferred_element_type=jnp.float32) + b2  # (T, H)
        h = _layernorm(ffn + h1, ln2_g, ln2_b)
        hs_ref[l + 1] = h

    # ---- fused epilogue: [CLS] gather (via selection matmul), pooler, classifier, CE ----
    hw = hw_ref[...]                                      # (H, H+128) bf16
    pooler_w = hw[:, 0:H]
    cls_w = hw[:, H:]

    row_id = jax.lax.broadcasted_iota(jnp.int32, (batch, tokens), 0)
    col_id = jax.lax.broadcasted_iota(jnp.int32, (batch, tokens), 1)
    sel = jnp.where(col_id == row_id * seq, 1.0, 0.0).astype(jnp.bfloat16)  # (B, T)
    cls_tok = jnp.dot(sel, h.astype(jnp.bfloat16),
                      preferred_element_type=jnp.float32)                   # (B, H)

    pooled = jnp.tanh(jnp.dot(cls_tok.astype(jnp.bfloat16), pooler_w,
                              preferred_element_type=jnp.float32) + pooler_b)
    # TODO(synk): training-mode dropout (p=0.1) via pltpu.prng not implemented; eval == identity.
    logits = jnp.dot(pooled.astype(jnp.bfloat16), cls_w,
                     preferred_element_type=jnp.float32) + cls_b            # (B, 128)
    logits_ref[...] = logits

    if compute_loss:
        # pad columns carry NEG_PAD bias -> exp() == 0, so lse over 128 == lse over 2
        m = jnp.max(logits, axis=-1, keepdims=True)
        lse = m + jnp.log(jnp.sum(jnp.exp(logits - m), axis=-1, keepdims=True))
        nll = lse - jnp.sum(logits * onehot_ref[...], axis=-1, keepdims=True)   # (B, 1)
        loss_ref[...] = jnp.mean(nll, keepdims=True)
    else:
        loss_ref[...] = jnp.zeros((1, 1), jnp.float32)


# ---------------- pallas_call wrapper ----------------
def bert_forward_fused(emb_flat, mask_add, prep, onehot, batch, seq, compute_loss):
    T, H = emb_flat.shape
    L = NUM_LAYERS
    I = INTERMEDIATE
    LPAD = NUM_LABELS_PAD
    kernel = partial(_bert_forward_kernel,
                     num_layers=L, num_heads=NUM_HEADS, head_dim=HEAD_DIM,
                     hidden=HIDDEN, inter=I, batch=batch, seq=seq,
                     scale=1.0 / math.sqrt(HEAD_DIM), compute_loss=compute_loss)
    hs, logits_pad, loss = pl.pallas_call(
        kernel,
        grid=(1,),
        in_specs=[
            pl.BlockSpec((T, H), lambda i: (0, 0)),                       # embeddings (flattened)
            pl.BlockSpec((T, T), lambda i: (0, 0)),                       # additive block-diag mask
            pl.BlockSpec((L, H, 4 * H + 2 * I), lambda i: (0, 0, 0)),     # packed layer weights (bf16)
            pl.BlockSpec((L, 3, 128), lambda i: (0, 0, 0)),               # packed layer vectors (f32)
            pl.BlockSpec((H, H + LPAD), lambda i: (0, 0)),                # pooler W | classifier W (bf16)
            pl.BlockSpec((2, 128), lambda i: (0, 0)),                     # emb LN / pooler b / cls b
            pl.BlockSpec((batch, LPAD), lambda i: (0, 0)),                # one-hot labels (padded)
        ],
        out_specs=(
            pl.BlockSpec((L + 1, T, H), lambda i: (0, 0, 0)),             # stacked hidden states
            pl.BlockSpec((batch, LPAD), lambda i: (0, 0)),                # lane-dense logits slab
            pl.BlockSpec((1, 1), lambda i: (0, 0)),                       # loss
        ),
        out_shape=(
            jax.ShapeDtypeStruct((L + 1, T, H), jnp.float32),
            jax.ShapeDtypeStruct((batch, LPAD), jnp.float32),
            jax.ShapeDtypeStruct((1, 1), jnp.float32),
        ),
        compiler_params=pltpu.CompilerParams(dimension_semantics=("arbitrary",)),
    )(emb_flat, mask_add, prep["layer_w"], prep["layer_v"],
      prep["head_w"], prep["head_v"], onehot)
    return hs, logits_pad, loss


# ---------------- parameters (deterministic, in-script) ----------------
def init_params(key):
    """Torch-module-mirroring parameter pytree (separate Wq/Wk/Wv, f32)."""
    def norm(k, shape, scale=0.02):
        return scale * jax.random.normal(k, shape, dtype=jnp.float32)

    keys = iter(jax.random.split(key, 128))
    p = {
        "word_emb": norm(next(keys), (VOCAB, HIDDEN)),
        "pos_emb": norm(next(keys), (MAX_POS, HIDDEN)),
        "type_emb": norm(next(keys), (TYPE_VOCAB, HIDDEN)),
        "emb_ln_g": jnp.ones((HIDDEN,), jnp.float32),
        "emb_ln_b": jnp.zeros((HIDDEN,), jnp.float32),
        "layers": [],
    }
    for _ in range(NUM_LAYERS):
        p["layers"].append({
            "wq": norm(next(keys), (HIDDEN, HIDDEN)), "bq": jnp.zeros((HIDDEN,), jnp.float32),
            "wk": norm(next(keys), (HIDDEN, HIDDEN)), "bk": jnp.zeros((HIDDEN,), jnp.float32),
            "wv": norm(next(keys), (HIDDEN, HIDDEN)), "bv": jnp.zeros((HIDDEN,), jnp.float32),
            "wo": norm(next(keys), (HIDDEN, HIDDEN)), "bo": jnp.zeros((HIDDEN,), jnp.float32),
            "ln1_g": jnp.ones((HIDDEN,), jnp.float32), "ln1_b": jnp.zeros((HIDDEN,), jnp.float32),
            "w1": norm(next(keys), (HIDDEN, INTERMEDIATE)), "b1": jnp.zeros((INTERMEDIATE,), jnp.float32),
            "w2": norm(next(keys), (INTERMEDIATE, HIDDEN)), "b2": jnp.zeros((HIDDEN,), jnp.float32),
            "ln2_g": jnp.ones((HIDDEN,), jnp.float32), "ln2_b": jnp.zeros((HIDDEN,), jnp.float32),
        })
    p["pooler_w"] = norm(next(keys), (HIDDEN, HIDDEN))
    p["pooler_b"] = jnp.zeros((HIDDEN,), jnp.float32)
    # classifier added via add_dataset()/set_dataset(): Linear(HIDDEN, NUM_LABELS)
    p["cls_w"] = norm(next(keys), (HIDDEN, NUM_LABELS))
    p["cls_b"] = jnp.zeros((NUM_LABELS,), jnp.float32)
    return p


def prepare_params(p):
    """One-time kernel-friendly repack:
      layer_w (L, H, 4H+2I) bf16 : [Wqkv | Wo | W1 | W2^T] per layer
      layer_v (L, 3, 128)   f32  : row0=[bqkv], row1=[bo|ln1_g|ln1_b|b2], row2=[b1|ln2_g|ln2_b]
      head_w  (H, H+128)    bf16 : [pooler_w | classifier_w zero-padded to 128]
      head_v  (2, 128)      f32  : row0=[emb_ln_g|emb_ln_b|pooler_b|0], row1=cls_b (NEG_PAD-padded)
    """
    H, I = HIDDEN, INTERMEDIATE
    LPAD = NUM_LABELS_PAD

    layer_w, layer_v = [], []
    for Lr in p["layers"]:
        wqkv = jnp.concatenate([Lr["wq"], Lr["wk"], Lr["wv"]], axis=1)          # (H, 3H)
        layer_w.append(jnp.concatenate([wqkv, Lr["wo"], Lr["w1"], Lr["w2"].T], axis=1))
        bqkv = jnp.concatenate([Lr["bq"], Lr["bk"], Lr["bv"]])
        row0 = jnp.concatenate([bqkv, jnp.zeros((128 - 3 * H,), jnp.float32)])
        row1 = jnp.concatenate([Lr["bo"], Lr["ln1_g"], Lr["ln1_b"], Lr["b2"]])
        row2 = jnp.concatenate([Lr["b1"], Lr["ln2_g"], Lr["ln2_b"]])
        layer_v.append(jnp.stack([row0, row1, row2], axis=0))                    # (3, 128)

    cls_w_pad = jnp.zeros((H, LPAD), jnp.float32).at[:, :NUM_LABELS].set(p["cls_w"])
    head_w = jnp.concatenate([p["pooler_w"], cls_w_pad], axis=1)                 # (H, H+128)
    hrow0 = jnp.concatenate([p["emb_ln_g"], p["emb_ln_b"], p["pooler_b"],
                             jnp.zeros((128 - 3 * H,), jnp.float32)])
    hrow1 = jnp.full((LPAD,), NEG_PAD, jnp.float32).at[:NUM_LABELS].set(p["cls_b"])

    return {
        "word_emb": p["word_emb"], "pos_emb": p["pos_emb"], "type_emb": p["type_emb"],
        "layer_w": jnp.stack(layer_w, axis=0).astype(jnp.bfloat16),   # (L, H, 4H+2I)
        "layer_v": jnp.stack(layer_v, axis=0),                        # (L, 3, 128)
        "head_w": head_w.astype(jnp.bfloat16),                        # (H, H+128)
        "head_v": jnp.stack([hrow0, hrow1], axis=0),                  # (2, 128)
    }


# ---------------- forward (mirrors BertClassifier_base.forward) ----------------
def forward(prep, input_ids, attention_mask=None, token_type_ids=None, labels=None):
    B, S = input_ids.shape
    H = HIDDEN
    T = B * S

    # --- embeddings (table lookup is glue; everything else is the fused Pallas kernel) ---
    we = prep["word_emb"][input_ids]                        # (B,S,H)
    pe = prep["pos_emb"][jnp.arange(S)][None, :, :]         # (1,S,H)
    te = prep["type_emb"][token_type_ids] if token_type_ids is not None else 0.0
    emb = (we + pe + te).astype(jnp.float32).reshape(T, H)  # (T,H)

    # additive (T, T) mask: BERT padding mask within a sequence, -1e9 across sequences
    if attention_mask is None:
        attention_mask = jnp.ones((B, S), jnp.float32)
    amf = attention_mask.astype(jnp.float32).reshape(T)
    batch_of = jnp.arange(T) // S
    same_batch = batch_of[:, None] == batch_of[None, :]
    mask_add = jnp.where(same_batch, (1.0 - amf)[None, :] * -10000.0,
                         CROSS_BATCH_MASK).astype(jnp.float32)

    compute_loss = labels is not None
    onehot = (jax.nn.one_hot(labels, NUM_LABELS_PAD, dtype=jnp.float32)
              if compute_loss else jnp.zeros((B, NUM_LABELS_PAD), jnp.float32))

    hs, logits_pad, loss = bert_forward_fused(emb, mask_add, prep, onehot,
                                              B, S, compute_loss)

    hidden_states = tuple(hs[i].reshape(B, S, H) for i in range(NUM_LAYERS + 1))
    logits = logits_pad[:, :NUM_LABELS]

    outputs = (logits, hidden_states)                       # mirrors (logits,) + outputs[2:]
    if compute_loss:
        outputs = (loss[0, 0],) + outputs
    return outputs


if __name__ == "__main__":
    root = jax.random.PRNGKey(0)
    k_params, k_ids = jax.random.split(root)
    params = init_params(k_params)
    prep = prepare_params(params)

    B, S = 2, 8
    input_ids = jax.random.randint(k_ids, (B, S), 0, VOCAB, dtype=jnp.int32)
    attention_mask = jnp.ones((B, S), jnp.float32).at[1, 6:].set(0.0)  # pad 2 tokens
    token_type_ids = jnp.zeros((B, S), jnp.int32)
    labels = jnp.array([0, 1], jnp.int32)

    loss, logits, hidden_states = forward(prep, input_ids, attention_mask,
                                          token_type_ids, labels=labels)
    jax.block_until_ready((loss, logits, hidden_states))
    assert logits.shape == (B, NUM_LABELS)
    assert loss.shape == ()
    assert len(hidden_states) == NUM_LAYERS + 1
    assert hidden_states[0].shape == (B, S, HIDDEN)
    assert bool(jnp.isfinite(loss)) and bool(jnp.all(jnp.isfinite(logits)))
    print("KERNEL_OK")
</pallas_src>

<mosaic_0001>
module attributes {stable_mosaic.version = 11 : i64} {
  func.func @_bert_forward_kernel(%arg0: i32, %arg1: memref<16x32xf32, #tpu.memory_space<vmem>>, %arg2: memref<16x16xf32, #tpu.memory_space<vmem>>, %arg3: memref<2x32x256xbf16, #tpu.memory_space<vmem>>, %arg4: memref<2x3x128xf32, #tpu.memory_space<vmem>>, %arg5: memref<32x160xbf16, #tpu.memory_space<vmem>>, %arg6: memref<2x128xf32, #tpu.memory_space<vmem>>, %arg7: memref<2x128xf32, #tpu.memory_space<vmem>>, %arg8: memref<3x16x32xf32, #tpu.memory_space<vmem>>, %arg9: memref<2x128xf32, #tpu.memory_space<vmem>>, %arg10: memref<1x1xf32, #tpu.memory_space<vmem>>) attributes {dimension_semantics = [#tpu.dimension_semantics<arbitrary>], iteration_bounds = array<i64: 1>, scalar_prefetch = 0 : i64, scratch_operands = 0 : i64, tpu.core_type = #tpu.core_type<tc>, window_params = [{pipeline_mode = #tpu.pipeline_mode<synchronous>, transform_indices = @transform_0, window_bounds = array<i64: 16, 32>}, {pipeline_mode = #tpu.pipeline_mode<synchronous>, transform_indices = @transform_1, window_bounds = array<i64: 16, 16>}, {pipeline_mode = #tpu.pipeline_mode<synchronous>, transform_indices = @transform_2, window_bounds = array<i64: 2, 32, 256>}, {pipeline_mode = #tpu.pipeline_mode<synchronous>, transform_indices = @transform_3, window_bounds = array<i64: 2, 3, 128>}, {pipeline_mode = #tpu.pipeline_mode<synchronous>, transform_indices = @transform_4, window_bounds = array<i64: 32, 160>}, {pipeline_mode = #tpu.pipeline_mode<synchronous>, transform_indices = @transform_5, window_bounds = array<i64: 2, 128>}, {pipeline_mode = #tpu.pipeline_mode<synchronous>, transform_indices = @transform_6, window_bounds = array<i64: 2, 128>}, {pipeline_mode = #tpu.pipeline_mode<synchronous>, transform_indices = @transform_7, window_bounds = array<i64: 3, 16, 32>}, {pipeline_mode = #tpu.pipeline_mode<synchronous>, transform_indices = @transform_8, window_bounds = array<i64: 2, 128>}, {pipeline_mode = #tpu.pipeline_mode<synchronous>, transform_indices = @transform_9, window_bounds = array<i64: 1, 1>}]} {
    %c0 = arith.constant 0 : index
    %c0_0 = arith.constant 0 : index
    %0 = vector.load %arg6[%c0, %c0_0] : memref<2x128xf32, #tpu.memory_space<vmem>>, vector<2x128xf32>
    %1 = vector.extract_strided_slice %0 {offsets = [0, 0], sizes = [1, 32], strides = [1, 1]} : vector<2x128xf32> to vector<1x32xf32>
    %2 = vector.extract_strided_slice %0 {offsets = [0, 32], sizes = [1, 32], strides = [1, 1]} : vector<2x128xf32> to vector<1x32xf32>
    %3 = vector.extract_strided_slice %0 {offsets = [0, 64], sizes = [1, 32], strides = [1, 1]} : vector<2x128xf32> to vector<1x32xf32>
    %4 = vector.extract_strided_slice %0 {offsets = [1, 0], sizes = [1, 128], strides = [1, 1]} : vector<2x128xf32> to vector<1x128xf32>
    %c0_1 = arith.constant 0 : index
    %c0_2 = arith.constant 0 : index
    %5 = vector.load %arg1[%c0_1, %c0_2] : memref<16x32xf32, #tpu.memory_space<vmem>>, vector<16x32xf32>
    %cst = arith.constant dense<0.000000e+00> : vector<16xf32>
    %6 = vector.multi_reduction <add>, %5, %cst [1] : vector<16x32xf32> to vector<16xf32>
    %7 = vector.shape_cast %6 : vector<16xf32> to vector<16x1xf32>
    %cst_3 = arith.constant 3.200000e+01 : f32
    %8 = vector.broadcast %cst_3 : f32 to vector<16x1xf32>
    %9 = arith.divf %7, %8 : vector<16x1xf32>
    %10 = vector.broadcast %9 : vector<16x1xf32> to vector<16x32xf32>
    %11 = arith.subf %5, %10 : vector<16x32xf32>
    %12 = arith.mulf %11, %11 : vector<16x32xf32>
    %cst_4 = arith.constant dense<0.000000e+00> : vector<16xf32>
    %13 = vector.multi_reduction <add>, %12, %cst_4 [1] : vector<16x32xf32> to vector<16xf32>
    %14 = vector.shape_cast %13 : vector<16xf32> to vector<16x1xf32>
    %cst_5 = arith.constant 3.200000e+01 : f32
    %15 = vector.broadcast %cst_5 : f32 to vector<16x1xf32>
    %16 = arith.divf %14, %15 : vector<16x1xf32>
    %cst_6 = arith.constant 9.99999996E-13 : f32
    %17 = vector.broadcast %cst_6 : f32 to vector<16x1xf32>
    %18 = arith.addf %16, %17 : vector<16x1xf32>
    %19 = math.rsqrt %18 : vector<16x1xf32>
    %20 = vector.broadcast %19 : vector<16x1xf32> to vector<16x32xf32>
    %21 = arith.mulf %11, %20 : vector<16x32xf32>
    %22 = vector.broadcast %1 : vector<1x32xf32> to vector<16x32xf32>
    %23 = arith.mulf %21, %22 : vector<16x32xf32>
    %24 = vector.broadcast %2 : vector<1x32xf32> to vector<16x32xf32>
    %25 = arith.addf %23, %24 : vector<16x32xf32>
    %c0_7 = arith.constant 0 : index
    %c0_8 = arith.constant 0 : index
    %c0_9 = arith.constant 0 : index
    %26 = vector.load %arg8[%c0_7, %c0_8, %c0_9] : memref<3x16x32xf32, #tpu.memory_space<vmem>>, vector<1x16x32xf32>
    %27 = vector.shape_cast %26 : vector<1x16x32xf32> to vector<16x32xf32>
    %28 = vector.shape_cast %25 : vector<16x32xf32> to vector<1x16x32xf32>
    tpu.vector_store %arg8[%c0_7, %c0_8, %c0_9], %28 {strides = array<i32>} : memref<3x16x32xf32, #tpu.memory_space<vmem>>, vector<1x16x32xf32>,
    %c0_10 = arith.constant 0 : index
    %c0_11 = arith.constant 0 : index
    %29 = vector.load %arg2[%c0_10, %c0_11] : memref<16x16xf32, #tpu.memory_space<vmem>>, vector<16x16xf32>
    %c0_12 = arith.constant 0 : index
    %c0_13 = arith.constant 0 : index
    %c0_14 = arith.constant 0 : index
    %30 = vector.load %arg3[%c0_12, %c0_13, %c0_14] : memref<2x32x256xbf16, #tpu.memory_space<vmem>>, vector<1x32x256xbf16>
    %31 = vector.shape_cast %30 : vector<1x32x256xbf16> to vector<32x256xbf16>
    %c0_15 = arith.constant 0 : index
    %c0_16 = arith.constant 0 : index
    %c0_17 = arith.constant 0 : index
    %32 = vector.load %arg4[%c0_15, %c0_16, %c0_17] : memref<2x3x128xf32, #tpu.memory_space<vmem>>, vector<1x3x128xf32>
    %33 = vector.shape_cast %32 : vector<1x3x128xf32> to vector<3x128xf32>
    %34 = vector.extract_strided_slice %31 {offsets = [0, 0], sizes = [32, 96], strides = [1, 1]} : vector<32x256xbf16> to vector<32x96xbf16>
    %35 = vector.extract_strided_slice %31 {offsets = [0, 96], sizes = [32, 32], strides = [1, 1]} : vector<32x256xbf16> to vector<32x32xbf16>
    %36 = vector.extract_strided_slice %31 {offsets = [0, 128], sizes = [32, 64], strides = [1, 1]} : vector<32x256xbf16> to vector<32x64xbf16>
    %37 = vector.extract_strided_slice %31 {offsets = [0, 192], sizes = [32, 64], strides = [1, 1]} : vector<32x256xbf16> to vector<32x64xbf16>
    %38 = vector.extract_strided_slice %33 {offsets = [0, 0], sizes = [1, 96], strides = [1, 1]} : vector<3x128xf32> to vector<1x96xf32>
    %39 = vector.extract_strided_slice %33 {offsets = [1, 0], sizes = [1, 32], strides = [1, 1]} : vector<3x128xf32> to vector<1x32xf32>
    %40 = vector.extract_strided_slice %33 {offsets = [1, 32], sizes = [1, 32], strides = [1, 1]} : vector<3x128xf32> to vector<1x32xf32>
    %41 = vector.extract_strided_slice %33 {offsets = [1, 64], sizes = [1, 32], strides = [1, 1]} : vector<3x128xf32> to vector<1x32xf32>
    %42 = vector.extract_strided_slice %33 {offsets = [1, 96], sizes = [1, 32], strides = [1, 1]} : vector<3x128xf32> to vector<1x32xf32>
    %43 = vector.extract_strided_slice %33 {offsets = [2, 0], sizes = [1, 64], strides = [1, 1]} : vector<3x128xf32> to vector<1x64xf32>
    %44 = vector.extract_strided_slice %33 {offsets = [2, 64], sizes = [1, 32], strides = [1, 1]} : vector<3x128xf32> to vector<1x32xf32>
    %45 = vector.extract_strided_slice %33 {offsets = [2, 96], sizes = [1, 32], strides = [1, 1]} : vector<3x128xf32> to vector<1x32xf32>
    %46 = arith.truncf %25 : vector<16x32xf32> to vector<16x32xbf16>
    %cst_18 = arith.constant dense<0.000000e+00> : vector<16x96xf32>
    %47 = tpu.matmul %46, %34, %cst_18 {dimension_numbers = #tpu.dot_dimension_numbers<[1], [0], [0], [1], [0, 0, 1, 1], [], []>} : vector<16x32xbf16>, vector<32x96xbf16>, vector<16x96xf32> -> vector<16x96xf32>
    %48 = vector.broadcast %38 : vector<1x96xf32> to vector<16x96xf32>
    %49 = arith.addf %47, %48 : vector<16x96xf32>
    %50 = arith.truncf %49 : vector<16x96xf32> to vector<16x96xbf16>
    %cst_19 = arith.constant 0.000000e+00 : f32
    %51 = vector.broadcast %cst_19 : f32 to vector<16x32xf32>
    %52 = vector.extract_strided_slice %50 {offsets = [0, 0], sizes = [16, 8], strides = [1, 1]} : vector<16x96xbf16> to vector<16x8xbf16>
    %53 = vector.extract_strided_slice %50 {offsets = [0, 32], sizes = [16, 8], strides = [1, 1]} : vector<16x96xbf16> to vector<16x8xbf16>
    %54 = vector.extract_strided_slice %50 {offsets = [0, 64], sizes = [16, 8], strides = [1, 1]} : vector<16x96xbf16> to vector<16x8xbf16>
    %cst_20 = arith.constant dense<0.000000e+00> : vector<16x16xf32>
    %55 = tpu.matmul %52, %53, %cst_20 {dimension_numbers = #tpu.dot_dimension_numbers<[1], [1], [0], [0], [0, 0, 1, 0], [], []>} : vector<16x8xbf16>, vector<16x8xbf16>, vector<16x16xf32> -> vector<16x16xf32>
    %cst_21 = arith.constant 0.353553385 : f32
    %56 = vector.broadcast %cst_21 : f32 to vector<16x16xf32>
    %57 = arith.mulf %55, %56 : vector<16x16xf32>
    %58 = arith.addf %57, %29 : vector<16x16xf32>
    %cst_22 = arith.constant dense<0xFF800000> : vector<16xf32>
    %59 = vector.multi_reduction <maximumf>, %58, %cst_22 [1] : vector<16x16xf32> to vector<16xf32>
    %60 = vector.shape_cast %59 : vector<16xf32> to vector<16x1xf32>
    %61 = vector.broadcast %60 : vector<16x1xf32> to vector<16x16xf32>
    %62 = arith.subf %58, %61 : vector<16x16xf32>
    %63 = math.exp %62 : vector<16x16xf32>
    %cst_23 = arith.constant dense<0.000000e+00> : vector<16xf32>
    %64 = vector.multi_reduction <add>, %63, %cst_23 [1] : vector<16x16xf32> to vector<16xf32>
    %65 = vector.shape_cast %64 : vector<16xf32> to vector<16x1xf32>
    %66 = tpu.reciprocal %65 {approx = true} : vector<16x1xf32> -> vector<16x1xf32>
    %67 = vector.broadcast %66 : vector<16x1xf32> to vector<16x16xf32>
    %68 = arith.mulf %63, %67 : vector<16x16xf32>
    %69 = arith.truncf %68 : vector<16x16xf32> to vector<16x16xbf16>
    %cst_24 = arith.constant dense<0.000000e+00> : vector<16x8xf32>
    %70 = tpu.matmul %69, %54, %cst_24 {dimension_numbers = #tpu.dot_dimension_numbers<[1], [0], [0], [1], [0, 0, 1, 1], [], []>} : vector<16x16xbf16>, vector<16x8xbf16>, vector<16x8xf32> -> vector<16x8xf32>
    %71 = arith.truncf %70 : vector<16x8xf32> to vector<16x8xbf16>
    %72 = vector.extract_strided_slice %35 {offsets = [0, 0], sizes = [8, 32], strides = [1, 1]} : vector<32x32xbf16> to vector<8x32xbf16>
    %cst_25 = arith.constant dense<0.000000e+00> : vector<16x32xf32>
    %73 = tpu.matmul %71, %72, %cst_25 {dimension_numbers = #tpu.dot_dimension_numbers<[1], [0], [0], [1], [0, 0, 1, 1], [], []>} : vector<16x8xbf16>, vector<8x32xbf16>, vector<16x32xf32> -> vector<16x32xf32>
    %74 = arith.addf %51, %73 : vector<16x32xf32>
    %75 = vector.extract_strided_slice %50 {offsets = [0, 8], sizes = [16, 8], strides = [1, 1]} : vector<16x96xbf16> to vector<16x8xbf16>
    %76 = vector.extract_strided_slice %50 {offsets = [0, 40], sizes = [16, 8], strides = [1, 1]} : vector<16x96xbf16> to vector<16x8xbf16>
    %77 = vector.extract_strided_slice %50 {offsets = [0, 72], sizes = [16, 8], strides = [1, 1]} : vector<16x96xbf16> to vector<16x8xbf16>
    %cst_26 = arith.constant dense<0.000000e+00> : vector<16x16xf32>
    %78 = tpu.matmul %75, %76, %cst_26 {dimension_numbers = #tpu.dot_dimension_numbers<[1], [1], [0], [0], [0, 0, 1, 0], [], []>} : vector<16x8xbf16>, vector<16x8xbf16>, vector<16x16xf32> -> vector<16x16xf32>
    %cst_27 = arith.constant 0.353553385 : f32
    %79 = vector.broadcast %cst_27 : f32 to vector<16x16xf32>
    %80 = arith.mulf %78, %79 : vector<16x16xf32>
    %81 = arith.addf %80, %29 : vector<16x16xf32>
    %cst_28 = arith.constant dense<0xFF800000> : vector<16xf32>
    %82 = vector.multi_reduction <maximumf>, %81, %cst_28 [1] : vector<16x16xf32> to vector<16xf32>
    %83 = vector.shape_cast %82 : vector<16xf32> to vector<16x1xf32>
    %84 = vector.broadcast %83 : vector<16x1xf32> to vector<16x16xf32>
    %85 = arith.subf %81, %84 : vector<16x16xf32>
    %86 = math.exp %85 : vector<16x16xf32>
    %cst_29 = arith.constant dense<0.000000e+00> : vector<16xf32>
    %87 = vector.multi_reduction <add>, %86, %cst_29 [1] : vector<16x16xf32> to vector<16xf32>
    %88 = vector.shape_cast %87 : vector<16xf32> to vector<16x1xf32>
    %89 = tpu.reciprocal %88 {approx = true} : vector<16x1xf32> -> vector<16x1xf32>
    %90 = vector.broadcast %89 : vector<16x1xf32> to vector<16x16xf32>
    %91 = arith.mulf %86, %90 : vector<16x16xf32>
    %92 = arith.truncf %91 : vector<16x16xf32> to vector<16x16xbf16>
    %cst_30 = arith.constant dense<0.000000e+00> : vector<16x8xf32>
    %93 = tpu.matmul %92, %77, %cst_30 {dimension_numbers = #tpu.dot_dimension_numbers<[1], [0], [0], [1], [0, 0, 1, 1], [], []>} : vector<16x16xbf16>, vector<16x8xbf16>, vector<16x8xf32> -> vector<16x8xf32>
    %94 = arith.truncf %93 : vector<16x8xf32> to vector<16x8xbf16>
    %95 = vector.extract_strided_slice %35 {offsets = [8, 0], sizes = [8, 32], strides = [1, 1]} : vector<32x32xbf16> to vector<8x32xbf16>
    %cst_31 = arith.constant dense<0.000000e+00> : vector<16x32xf32>
    %96 = tpu.matmul %94, %95, %cst_31 {dimension_numbers = #tpu.dot_dimension_numbers<[1], [0], [0], [1], [0, 0, 1, 1], [], []>} : vector<16x8xbf16>, vector<8x32xbf16>, vector<16x32xf32> -> vector<16x32xf32>
    %97 = arith.addf %74, %96 : vector<16x32xf32>
    %98 = vector.extract_strided_slice %50 {offsets = [0, 16], sizes = [16, 8], strides = [1, 1]} : vector<16x96xbf16> to vector<16x8xbf16>
    %99 = vector.extract_strided_slice %50 {offsets = [0, 48], sizes = [16, 8], strides = [1, 1]} : vector<16x96xbf16> to vector<16x8xbf16>
    %100 = vector.extract_strided_slice %50 {offsets = [0, 80], sizes = [16, 8], strides = [1, 1]} : vector<16x96xbf16> to vector<16x8xbf16>
    %cst_32 = arith.constant dense<0.000000e+00> : vector<16x16xf32>
    %101 = tpu.matmul %98, %99, %cst_32 {dimension_numbers = #tpu.dot_dimension_numbers<[1], [1], [0], [0], [0, 0, 1, 0], [], []>} : vector<16x8xbf16>, vector<16x8xbf16>, vector<16x16xf32> -> vector<16x16xf32>
    %cst_33 = arith.constant 0.353553385 : f32
    %102 = vector.broadcast %cst_33 : f32 to vector<16x16xf32>
    %103 = arith.mulf %101, %102 : vector<16x16xf32>
    %104 = arith.addf %103, %29 : vector<16x16xf32>
    %cst_34 = arith.constant dense<0xFF800000> : vector<16xf32>
    %105 = vector.multi_reduction <maximumf>, %104, %cst_34 [1] : vector<16x16xf32> to vector<16xf32>
    %106 = vector.shape_cast %105 : vector<16xf32> to vector<16x1xf32>
    %107 = vector.broadcast %106 : vector<16x1xf32> to vector<16x16xf32>
    %108 = arith.subf %104, %107 : vector<16x16xf32>
    %109 = math.exp %108 : vector<16x16xf32>
    %cst_35 = arith.constant dense<0.000000e+00> : vector<16xf32>
    %110 = vector.multi_reduction <add>, %109, %cst_35 [1] : vector<16x16xf32> to vector<16xf32>
    %111 = vector.shape_cast %110 : vector<16xf32> to vector<16x1xf32>
    %112 = tpu.reciprocal %111 {approx = true} : vector<16x1xf32> -> vector<16x1xf32>
    %113 = vector.broadcast %112 : vector<16x1xf32> to vector<16x16xf32>
    %114 = arith.mulf %109, %113 : vector<16x16xf32>
    %115 = arith.truncf %114 : vector<16x16xf32> to vector<16x16xbf16>
    %cst_36 = arith.constant dense<0.000000e+00> : vector<16x8xf32>
    %116 = tpu.matmul %115, %100, %cst_36 {dimension_numbers = #tpu.dot_dimension_numbers<[1], [0], [0], [1], [0, 0, 1, 1], [], []>} : vector<16x16xbf16>, vector<16x8xbf16>, vector<16x8xf32> -> vector<16x8xf32>
    %117 = arith.truncf %116 : vector<16x8xf32> to vector<16x8xbf16>
    %118 = vector.extract_strided_slice %35 {offsets = [16, 0], sizes = [8, 32], strides = [1, 1]} : vector<32x32xbf16> to vector<8x32xbf16>
    %cst_37 = arith.constant dense<0.000000e+00> : vector<16x32xf32>
    %119 = tpu.matmul %117, %118, %cst_37 {dimension_numbers = #tpu.dot_dimension_numbers<[1], [0], [0], [1], [0, 0, 1, 1], [], []>} : vector<16x8xbf16>, vector<8x32xbf16>, vector<16x32xf32> -> vector<16x32xf32>
    %120 = arith.addf %97, %119 : vector<16x32xf32>
    %121 = vector.extract_strided_slice %50 {offsets = [0, 24], sizes = [16, 8], strides = [1, 1]} : vector<16x96xbf16> to vector<16x8xbf16>
    %122 = vector.extract_strided_slice %50 {offsets = [0, 56], sizes = [16, 8], strides = [1, 1]} : vector<16x96xbf16> to vector<16x8xbf16>
    %123 = vector.extract_strided_slice %50 {offsets = [0, 88], sizes = [16, 8], strides = [1, 1]} : vector<16x96xbf16> to vector<16x8xbf16>
    %cst_38 = arith.constant dense<0.000000e+00> : vector<16x16xf32>
    %124 = tpu.matmul %121, %122, %cst_38 {dimension_numbers = #tpu.dot_dimension_numbers<[1], [1], [0], [0], [0, 0, 1, 0], [], []>} : vector<16x8xbf16>, vector<16x8xbf16>, vector<16x16xf32> -> vector<16x16xf32>
    %cst_39 = arith.constant 0.353553385 : f32
    %125 = vector.broadcast %cst_39 : f32 to vector<16x16xf32>
    %126 = arith.mulf %124, %125 : vector<16x16xf32>
    %127 = arith.addf %126, %29 : vector<16x16xf32>
    %cst_40 = arith.constant dense<0xFF800000> : vector<16xf32>
    %128 = vector.multi_reduction <maximumf>, %127, %cst_40 [1] : vector<16x16xf32> to vector<16xf32>
    %129 = vector.shape_cast %128 : vector<16xf32> to vector<16x1xf32>
    %130 = vector.broadcast %129 : vector<16x1xf32> to vector<16x16xf32>
    %131 = arith.subf %127, %130 : vector<16x16xf32>
    %132 = math.exp %131 : vector<16x16xf32>
    %cst_41 = arith.constant dense<0.000000e+00> : vector<16xf32>
    %133 = vector.multi_reduction <add>, %132, %cst_41 [1] : vector<16x16xf32> to vector<16xf32>
    %134 = vector.shape_cast %133 : vector<16xf32> to vector<16x1xf32>
    %135 = tpu.reciprocal %134 {approx = true} : vector<16x1xf32> -> vector<16x1xf32>
    %136 = vector.broadcast %135 : vector<16x1xf32> to vector<16x16xf32>
    %137 = arith.mulf %132, %136 : vector<16x16xf32>
    %138 = arith.truncf %137 : vector<16x16xf32> to vector<16x16xbf16>
    %cst_42 = arith.constant dense<0.000000e+00> : vector<16x8xf32>
    %139 = tpu.matmul %138, %123, %cst_42 {dimension_numbers = #tpu.dot_dimension_numbers<[1], [0], [0], [1], [0, 0, 1, 1], [], []>} : vector<16x16xbf16>, vector<16x8xbf16>, vector<16x8xf32> -> vector<16x8xf32>
    %140 = arith.truncf %139 : vector<16x8xf32> to vector<16x8xbf16>
    %141 = vector.extract_strided_slice %35 {offsets = [24, 0], sizes = [8, 32], strides = [1, 1]} : vector<32x32xbf16> to vector<8x32xbf16>
    %cst_43 = arith.constant dense<0.000000e+00> : vector<16x32xf32>
    %142 = tpu.matmul %140, %141, %cst_43 {dimension_numbers = #tpu.dot_dimension_numbers<[1], [0], [0], [1], [0, 0, 1, 1], [], []>} : vector<16x8xbf16>, vector<8x32xbf16>, vector<16x32xf32> -> vector<16x32xf32>
    %143 = arith.addf %120, %142 : vector<16x32xf32>
    %144 = vector.broadcast %39 : vector<1x32xf32> to vector<16x32xf32>
    %145 = arith.addf %143, %144 : vector<16x32xf32>
    %146 = arith.addf %145, %25 : vector<16x32xf32>
    %cst_44 = arith.constant dense<0.000000e+00> : vector<16xf32>
    %147 = vector.multi_reduction <add>, %146, %cst_44 [1] : vector<16x32xf32> to vector<16xf32>
    %148 = vector.shape_cast %147 : vector<16xf32> to vector<16x1xf32>
    %cst_45 = arith.constant 3.200000e+01 : f32
    %149 = vector.broadcast %cst_45 : f32 to vector<16x1xf32>
    %150 = arith.divf %148, %149 : vector<16x1xf32>
    %151 = vector.broadcast %150 : vector<16x1xf32> to vector<16x32xf32>
    %152 = arith.subf %146, %151 : vector<16x32xf32>
    %153 = arith.mulf %152, %152 : vector<16x32xf32>
    %cst_46 = arith.constant dense<0.000000e+00> : vector<16xf32>
    %154 = vector.multi_reduction <add>, %153, %cst_46 [1] : vector<16x32xf32> to vector<16xf32>
    %155 = vector.shape_cast %154 : vector<16xf32> to vector<16x1xf32>
    %cst_47 = arith.constant 3.200000e+01 : f32
    %156 = vector.broadcast %cst_47 : f32 to vector<16x1xf32>
    %157 = arith.divf %155, %156 : vector<16x1xf32>
    %cst_48 = arith.constant 9.99999996E-13 : f32
    %158 = vector.broadcast %cst_48 : f32 to vector<16x1xf32>
    %159 = arith.addf %157, %158 : vector<16x1xf32>
    %160 = math.rsqrt %159 : vector<16x1xf32>
    %161 = vector.broadcast %160 : vector<16x1xf32> to vector<16x32xf32>
    %162 = arith.mulf %152, %161 : vector<16x32xf32>
    %163 = vector.broadcast %40 : vector<1x32xf32> to vector<16x32xf32>
    %164 = arith.mulf %162, %163 : vector<16x32xf32>
    %165 = vector.broadcast %41 : vector<1x32xf32> to vector<16x32xf32>
    %166 = arith.addf %164, %165 : vector<16x32xf32>
    %167 = arith.truncf %166 : vector<16x32xf32> to vector<16x32xbf16>
    %cst_49 = arith.constant dense<0.000000e+00> : vector<16x64xf32>
    %168 = tpu.matmul %167, %36, %cst_49 {dimension_numbers = #tpu.dot_dimension_numbers<[1], [0], [0], [1], [0, 0, 1, 1], [], []>} : vector<16x32xbf16>, vector<32x64xbf16>, vector<16x64xf32> -> vector<16x64xf32>
    %169 = vector.broadcast %43 : vector<1x64xf32> to vector<16x64xf32>
    %170 = arith.addf %168, %169 : vector<16x64xf32>
    %cst_50 = arith.constant 5.000000e-01 : f32
    %171 = vector.broadcast %cst_50 : f32 to vector<16x64xf32>
    %172 = arith.mulf %171, %170 : vector<16x64xf32>
    %cst_51 = arith.constant 4.471500e-02 : f32
    %173 = vector.broadcast %cst_51 : f32 to vector<16x64xf32>
    %174 = arith.mulf %173, %170 : vector<16x64xf32>
    %175 = arith.mulf %174, %170 : vector<16x64xf32>
    %176 = arith.mulf %175, %170 : vector<16x64xf32>
    %177 = arith.addf %170, %176 : vector<16x64xf32>
    %cst_52 = arith.constant 0.797884583 : f32
    %178 = vector.broadcast %cst_52 : f32 to vector<16x64xf32>
    %179 = arith.mulf %178, %177 : vector<16x64xf32>
    %180 = math.tanh %179 : vector<16x64xf32>
    %cst_53 = arith.constant 1.000000e+00 : f32
    %181 = vector.broadcast %cst_53 : f32 to vector<16x64xf32>
    %182 = arith.addf %181, %180 : vector<16x64xf32>
    %183 = arith.mulf %172, %182 : vector<16x64xf32>
    %184 = arith.truncf %183 : vector<16x64xf32> to vector<16x64xbf16>
    %cst_54 = arith.constant dense<0.000000e+00> : vector<16x32xf32>
    %185 = tpu.matmul %184, %37, %cst_54 {dimension_numbers = #tpu.dot_dimension_numbers<[1], [1], [0], [0], [0, 0, 1, 0], [], []>} : vector<16x64xbf16>, vector<32x64xbf16>, vector<16x32xf32> -> vector<16x32xf32>
    %186 = vector.broadcast %42 : vector<1x32xf32> to vector<16x32xf32>
    %187 = arith.addf %185, %186 : vector<16x32xf32>
    %188 = arith.addf %187, %166 : vector<16x32xf32>
    %cst_55 = arith.constant dense<0.000000e+00> : vector<16xf32>
    %189 = vector.multi_reduction <add>, %188, %cst_55 [1] : vector<16x32xf32> to vector<16xf32>
    %190 = vector.shape_cast %189 : vector<16xf32> to vector<16x1xf32>
    %cst_56 = arith.constant 3.200000e+01 : f32
    %191 = vector.broadcast %cst_56 : f32 to vector<16x1xf32>
    %192 = arith.divf %190, %191 : vector<16x1xf32>
    %193 = vector.broadcast %192 : vector<16x1xf32> to vector<16x32xf32>
    %194 = arith.subf %188, %193 : vector<16x32xf32>
    %195 = arith.mulf %194, %194 : vector<16x32xf32>
    %cst_57 = arith.constant dense<0.000000e+00> : vector<16xf32>
    %196 = vector.multi_reduction <add>, %195, %cst_57 [1] : vector<16x32xf32> to vector<16xf32>
    %197 = vector.shape_cast %196 : vector<16xf32> to vector<16x1xf32>
    %cst_58 = arith.constant 3.200000e+01 : f32
    %198 = vector.broadcast %cst_58 : f32 to vector<16x1xf32>
    %199 = arith.divf %197, %198 : vector<16x1xf32>
    %cst_59 = arith.constant 9.99999996E-13 : f32
    %200 = vector.broadcast %cst_59 : f32 to vector<16x1xf32>
    %201 = arith.addf %199, %200 : vector<16x1xf32>
    %202 = math.rsqrt %201 : vector<16x1xf32>
    %203 = vector.broadcast %202 : vector<16x1xf32> to vector<16x32xf32>
    %204 = arith.mulf %194, %203 : vector<16x32xf32>
    %205 = vector.broadcast %44 : vector<1x32xf32> to vector<16x32xf32>
    %206 = arith.mulf %204, %205 : vector<16x32xf32>
    %207 = vector.broadcast %45 : vector<1x32xf32> to vector<16x32xf32>
    %208 = arith.addf %206, %207 : vector<16x32xf32>
    %c1 = arith.constant 1 : index
    %c0_60 = arith.constant 0 : index
    %c0_61 = arith.constant 0 : index
    %209 = vector.load %arg8[%c1, %c0_60, %c0_61] : memref<3x16x32xf32, #tpu.memory_space<vmem>>, vector<1x16x32xf32>
    %210 = vector.shape_cast %209 : vector<1x16x32xf32> to vector<16x32xf32>
    %211 = vector.shape_cast %208 : vector<16x32xf32> to vector<1x16x32xf32>
    tpu.vector_store %arg8[%c1, %c0_60, %c0_61], %211 {strides = array<i32>} : memref<3x16x32xf32, #tpu.memory_space<vmem>>, vector<1x16x32xf32>,
    %c1_62 = arith.constant 1 : index
    %c0_63 = arith.constant 0 : index
    %c0_64 = arith.constant 0 : index
    %212 = vector.load %arg3[%c1_62, %c0_63, %c0_64] : memref<2x32x256xbf16, #tpu.memory_space<vmem>>, vector<1x32x256xbf16>
    %213 = vector.shape_cast %212 : vector<1x32x256xbf16> to vector<32x256xbf16>
    %c1_65 = arith.constant 1 : index
    %c0_66 = arith.constant 0 : index
    %c0_67 = arith.constant 0 : index
    %214 = vector.load %arg4[%c1_65, %c0_66, %c0_67] : memref<2x3x128xf32, #tpu.memory_space<vmem>>, vector<1x3x128xf32>
    %215 = vector.shape_cast %214 : vector<1x3x128xf32> to vector<3x128xf32>
    %216 = vector.extract_strided_slice %213 {offsets = [0, 0], sizes = [32, 96], strides = [1, 1]} : vector<32x256xbf16> to vector<32x96xbf16>
    %217 = vector.extract_strided_slice %213 {offsets = [0, 96], sizes = [32, 32], strides = [1, 1]} : vector<32x256xbf16> to vector<32x32xbf16>
    %218 = vector.extract_strided_slice %213 {offsets = [0, 128], sizes = [32, 64], strides = [1, 1]} : vector<32x256xbf16> to vector<32x64xbf16>
    %219 = vector.extract_strided_slice %213 {offsets = [0, 192], sizes = [32, 64], strides = [1, 1]} : vector<32x256xbf16> to vector<32x64xbf16>
    %220 = vector.extract_strided_slice %215 {offsets = [0, 0], sizes = [1, 96], strides = [1, 1]} : vector<3x128xf32> to vector<1x96xf32>
    %221 = vector.extract_strided_slice %215 {offsets = [1, 0], sizes = [1, 32], strides = [1, 1]} : vector<3x128xf32> to vector<1x32xf32>
    %222 = vector.extract_strided_slice %215 {offsets = [1, 32], sizes = [1, 32], strides = [1, 1]} : vector<3x128xf32> to vector<1x32xf32>
    %223 = vector.extract_strided_slice %215 {offsets = [1, 64], sizes = [1, 32], strides = [1, 1]} : vector<3x128xf32> to vector<1x32xf32>
    %224 = vector.extract_strided_slice %215 {offsets = [1, 96], sizes = [1, 32], strides = [1, 1]} : vector<3x128xf32> to vector<1x32xf32>
    %225 = vector.extract_strided_slice %215 {offsets = [2, 0], sizes = [1, 64], strides = [1, 1]} : vector<3x128xf32> to vector<1x64xf32>
    %226 = vector.extract_strided_slice %215 {offsets = [2, 64], sizes = [1, 32], strides = [1, 1]} : vector<3x128xf32> to vector<1x32xf32>
    %227 = vector.extract_strided_slice %215 {offsets = [2, 96], sizes = [1, 32], strides = [1, 1]} : vector<3x128xf32> to vector<1x32xf32>
    %228 = arith.truncf %208 : vector<16x32xf32> to vector<16x32xbf16>
    %cst_68 = arith.constant dense<0.000000e+00> : vector<16x96xf32>
    %229 = tpu.matmul %228, %216, %cst_68 {dimension_numbers = #tpu.dot_dimension_numbers<[1], [0], [0], [1], [0, 0, 1, 1], [], []>} : vector<16x32xbf16>, vector<32x96xbf16>, vector<16x96xf32> -> vector<16x96xf32>
    %230 = vector.broadcast %220 : vector<1x96xf32> to vector<16x96xf32>
    %231 = arith.addf %229, %230 : vector<16x96xf32>
    %232 = arith.truncf %231 : vector<16x96xf32> to vector<16x96xbf16>
    %cst_69 = arith.constant 0.000000e+00 : f32
    %233 = vector.broadcast %cst_69 : f32 to vector<16x32xf32>
    %234 = vector.extract_strided_slice %232 {offsets = [0, 0], sizes = [16, 8], strides = [1, 1]} : vector<16x96xbf16> to vector<16x8xbf16>
    %235 = vector.extract_strided_slice %232 {offsets = [0, 32], sizes = [16, 8], strides = [1, 1]} : vector<16x96xbf16> to vector<16x8xbf16>
    %236 = vector.extract_strided_slice %232 {offsets = [0, 64], sizes = [16, 8], strides = [1, 1]} : vector<16x96xbf16> to vector<16x8xbf16>
    %cst_70 = arith.constant dense<0.000000e+00> : vector<16x16xf32>
    %237 = tpu.matmul %234, %235, %cst_70 {dimension_numbers = #tpu.dot_dimension_numbers<[1], [1], [0], [0], [0, 0, 1, 0], [], []>} : vector<16x8xbf16>, vector<16x8xbf16>, vector<16x16xf32> -> vector<16x16xf32>
    %cst_71 = arith.constant 0.353553385 : f32
    %238 = vector.broadcast %cst_71 : f32 to vector<16x16xf32>
    %239 = arith.mulf %237, %238 : vector<16x16xf32>
    %240 = arith.addf %239, %29 : vector<16x16xf32>
    %cst_72 = arith.constant dense<0xFF800000> : vector<16xf32>
    %241 = vector.multi_reduction <maximumf>, %240, %cst_72 [1] : vector<16x16xf32> to vector<16xf32>
    %242 = vector.shape_cast %241 : vector<16xf32> to vector<16x1xf32>
    %243 = vector.broadcast %242 : vector<16x1xf32> to vector<16x16xf32>
    %244 = arith.subf %240, %243 : vector<16x16xf32>
    %245 = math.exp %244 : vector<16x16xf32>
    %cst_73 = arith.constant dense<0.000000e+00> : vector<16xf32>
    %246 = vector.multi_reduction <add>, %245, %cst_73 [1] : vector<16x16xf32> to vector<16xf32>
    %247 = vector.shape_cast %246 : vector<16xf32> to vector<16x1xf32>
    %248 = tpu.reciprocal %247 {approx = true} : vector<16x1xf32> -> vector<16x1xf32>
    %249 = vector.broadcast %248 : vector<16x1xf32> to vector<16x16xf32>
    %250 = arith.mulf %245, %249 : vector<16x16xf32>
    %251 = arith.truncf %250 : vector<16x16xf32> to vector<16x16xbf16>
    %cst_74 = arith.constant dense<0.000000e+00> : vector<16x8xf32>
    %252 = tpu.matmul %251, %236, %cst_74 {dimension_numbers = #tpu.dot_dimension_numbers<[1], [0], [0], [1], [0, 0, 1, 1], [], []>} : vector<16x16xbf16>, vector<16x8xbf16>, vector<16x8xf32> -> vector<16x8xf32>
    %253 = arith.truncf %252 : vector<16x8xf32> to vector<16x8xbf16>
    %254 = vector.extract_strided_slice %217 {offsets = [0, 0], sizes = [8, 32], strides = [1, 1]} : vector<32x32xbf16> to vector<8x32xbf16>
    %cst_75 = arith.constant dense<0.000000e+00> : vector<16x32xf32>
    %255 = tpu.matmul %253, %254, %cst_75 {dimension_numbers = #tpu.dot_dimension_numbers<[1], [0], [0], [1], [0, 0, 1, 1], [], []>} : vector<16x8xbf16>, vector<8x32xbf16>, vector<16x32xf32> -> vector<16x32xf32>
    %256 = arith.addf %233, %255 : vector<16x32xf32>
    %257 = vector.extract_strided_slice %232 {offsets = [0, 8], sizes = [16, 8], strides = [1, 1]} : vector<16x96xbf16> to vector<16x8xbf16>
    %258 = vector.extract_strided_slice %232 {offsets = [0, 40], sizes = [16, 8], strides = [1, 1]} : vector<16x96xbf16> to vector<16x8xbf16>
    %259 = vector.extract_strided_slice %232 {offsets = [0, 72], sizes = [16, 8], strides = [1, 1]} : vector<16x96xbf16> to vector<16x8xbf16>
    %cst_76 = arith.constant dense<0.000000e+00> : vector<16x16xf32>
    %260 = tpu.matmul %257, %258, %cst_76 {dimension_numbers = #tpu.dot_dimension_numbers<[1], [1], [0], [0], [0, 0, 1, 0], [], []>} : vector<16x8xbf16>, vector<16x8xbf16>, vector<16x16xf32> -> vector<16x16xf32>
    %cst_77 = arith.constant 0.353553385 : f32
    %261 = vector.broadcast %cst_77 : f32 to vector<16x16xf32>
    %262 = arith.mulf %260, %261 : vector<16x16xf32>
    %263 = arith.addf %262, %29 : vector<16x16xf32>
    %cst_78 = arith.constant dense<0xFF800000> : vector<16xf32>
    %264 = vector.multi_reduction <maximumf>, %263, %cst_78 [1] : vector<16x16xf32> to vector<16xf32>
    %265 = vector.shape_cast %264 : vector<16xf32> to vector<16x1xf32>
    %266 = vector.broadcast %265 : vector<16x1xf32> to vector<16x16xf32>
    %267 = arith.subf %263, %266 : vector<16x16xf32>
    %268 = math.exp %267 : vector<16x16xf32>
    %cst_79 = arith.constant dense<0.000000e+00> : vector<16xf32>
    %269 = vector.multi_reduction <add>, %268, %cst_79 [1] : vector<16x16xf32> to vector<16xf32>
    %270 = vector.shape_cast %269 : vector<16xf32> to vector<16x1xf32>
    %271 = tpu.reciprocal %270 {approx = true} : vector<16x1xf32> -> vector<16x1xf32>
    %272 = vector.broadcast %271 : vector<16x1xf32> to vector<16x16xf32>
    %273 = arith.mulf %268, %272 : vector<16x16xf32>
    %274 = arith.truncf %273 : vector<16x16xf32> to vector<16x16xbf16>
    %cst_80 = arith.constant dense<0.000000e+00> : vector<16x8xf32>
    %275 = tpu.matmul %274, %259, %cst_80 {dimension_numbers = #tpu.dot_dimension_numbers<[1], [0], [0], [1], [0, 0, 1, 1], [], []>} : vector<16x16xbf16>, vector<16x8xbf16>, vector<16x8xf32> -> vector<16x8xf32>
    %276 = arith.truncf %275 : vector<16x8xf32> to vector<16x8xbf16>
    %277 = vector.extract_strided_slice %217 {offsets = [8, 0], sizes = [8, 32], strides = [1, 1]} : vector<32x32xbf16> to vector<8x32xbf16>
    %cst_81 = arith.constant dense<0.000000e+00> : vector<16x32xf32>
    %278 = tpu.matmul %276, %277, %cst_81 {dimension_numbers = #tpu.dot_dimension_numbers<[1], [0], [0], [1], [0, 0, 1, 1], [], []>} : vector<16x8xbf16>, vector<8x32xbf16>, vector<16x32xf32> -> vector<16x32xf32>
    %279 = arith.addf %256, %278 : vector<16x32xf32>
    %280 = vector.extract_strided_slice %232 {offsets = [0, 16], sizes = [16, 8], strides = [1, 1]} : vector<16x96xbf16> to vector<16x8xbf16>
    %281 = vector.extract_strided_slice %232 {offsets = [0, 48], sizes = [16, 8], strides = [1, 1]} : vector<16x96xbf16> to vector<16x8xbf16>
    %282 = vector.extract_strided_slice %232 {offsets = [0, 80], sizes = [16, 8], strides = [1, 1]} : vector<16x96xbf16> to vector<16x8xbf16>
    %cst_82 = arith.constant dense<0.000000e+00> : vector<16x16xf32>
    %283 = tpu.matmul %280, %281, %cst_82 {dimension_numbers = #tpu.dot_dimension_numbers<[1], [1], [0], [0], [0, 0, 1, 0], [], []>} : vector<16x8xbf16>, vector<16x8xbf16>, vector<16x16xf32> -> vector<16x16xf32>
    %cst_83 = arith.constant 0.353553385 : f32
    %284 = vector.broadcast %cst_83 : f32 to vector<16x16xf32>
    %285 = arith.mulf %283, %284 : vector<16x16xf32>
    %286 = arith.addf %285, %29 : vector<16x16xf32>
    %cst_84 = arith.constant dense<0xFF800000> : vector<16xf32>
    %287 = vector.multi_reduction <maximumf>, %286, %cst_84 [1] : vector<16x16xf32> to vector<16xf32>
    %288 = vector.shape_cast %287 : vector<16xf32> to vector<16x1xf32>
    %289 = vector.broadcast %288 : vector<16x1xf32> to vector<16x16xf32>
    %290 = arith.subf %286, %289 : vector<16x16xf32>
    %291 = math.exp %290 : vector<16x16xf32>
    %cst_85 = arith.constant dense<0.000000e+00> : vector<16xf32>
    %292 = vector.multi_reduction <add>, %291, %cst_85 [1] : vector<16x16xf32> to vector<16xf32>
    %293 = vector.shape_cast %292 : vector<16xf32> to vector<16x1xf32>
    %294 = tpu.reciprocal %293 {approx = true} : vector<16x1xf32> -> vector<16x1xf32>
    %295 = vector.broadcast %294 : vector<16x1xf32> to vector<16x16xf32>
    %296 = arith.mulf %291, %295 : vector<16x16xf32>
    %297 = arith.truncf %296 : vector<16x16xf32> to vector<16x16xbf16>
    %cst_86 = arith.constant dense<0.000000e+00> : vector<16x8xf32>
    %298 = tpu.matmul %297, %282, %cst_86 {dimension_numbers = #tpu.dot_dimension_numbers<[1], [0], [0], [1], [0, 0, 1, 1], [], []>} : vector<16x16xbf16>, vector<16x8xbf16>, vector<16x8xf32> -> vector<16x8xf32>
    %299 = arith.truncf %298 : vector<16x8xf32> to vector<16x8xbf16>
    %300 = vector.extract_strided_slice %217 {offsets = [16, 0], sizes = [8, 32], strides = [1, 1]} : vector<32x32xbf16> to vector<8x32xbf16>
    %cst_87 = arith.constant dense<0.000000e+00> : vector<16x32xf32>
    %301 = tpu.matmul %299, %300, %cst_87 {dimension_numbers = #tpu.dot_dimension_numbers<[1], [0], [0], [1], [0, 0, 1, 1], [], []>} : vector<16x8xbf16>, vector<8x32xbf16>, vector<16x32xf32> -> vector<16x32xf32>
    %302 = arith.addf %279, %301 : vector<16x32xf32>
    %303 = vector.extract_strided_slice %232 {offsets = [0, 24], sizes = [16, 8], strides = [1, 1]} : vector<16x96xbf16> to vector<16x8xbf16>
    %304 = vector.extract_strided_slice %232 {offsets = [0, 56], sizes = [16, 8], strides = [1, 1]} : vector<16x96xbf16> to vector<16x8xbf16>
    %305 = vector.extract_strided_slice %232 {offsets = [0, 88], sizes = [16, 8], strides = [1, 1]} : vector<16x96xbf16> to vector<16x8xbf16>
    %cst_88 = arith.constant dense<0.000000e+00> : vector<16x16xf32>
    %306 = tpu.matmul %303, %304, %cst_88 {dimension_numbers = #tpu.dot_dimension_numbers<[1], [1], [0], [0], [0, 0, 1, 0], [], []>} : vector<16x8xbf16>, vector<16x8xbf16>, vector<16x16xf32> -> vector<16x16xf32>
    %cst_89 = arith.constant 0.353553385 : f32
    %307 = vector.broadcast %cst_89 : f32 to vector<16x16xf32>
    %308 = arith.mulf %306, %307 : vector<16x16xf32>
    %309 = arith.addf %308, %29 : vector<16x16xf32>
    %cst_90 = arith.constant dense<0xFF800000> : vector<16xf32>
    %310 = vector.multi_reduction <maximumf>, %309, %cst_90 [1] : vector<16x16xf32> to vector<16xf32>
    %311 = vector.shape_cast %310 : vector<16xf32> to vector<16x1xf32>
    %312 = vector.broadcast %311 : vector<16x1xf32> to vector<16x16xf32>
    %313 = arith.subf %309, %312 : vector<16x16xf32>
    %314 = math.exp %313 : vector<16x16xf32>
    %cst_91 = arith.constant dense<0.000000e+00> : vector<16xf32>
    %315 = vector.multi_reduction <add>, %314, %cst_91 [1] : vector<16x16xf32> to vector<16xf32>
    %316 = vector.shape_cast %315 : vector<16xf32> to vector<16x1xf32>
    %317 = tpu.reciprocal %316 {approx = true} : vector<16x1xf32> -> vector<16x1xf32>
    %318 = vector.broadcast %317 : vector<16x1xf32> to vector<16x16xf32>
    %319 = arith.mulf %314, %318 : vector<16x16xf32>
    %320 = arith.truncf %319 : vector<16x16xf32> to vector<16x16xbf16>
    %cst_92 = arith.constant dense<0.000000e+00> : vector<16x8xf32>
    %321 = tpu.matmul %320, %305, %cst_92 {dimension_numbers = #tpu.dot_dimension_numbers<[1], [0], [0], [1], [0, 0, 1, 1], [], []>} : vector<16x16xbf16>, vector<16x8xbf16>, vector<16x8xf32> -> vector<16x8xf32>
    %322 = arith.truncf %321 : vector<16x8xf32> to vector<16x8xbf16>
    %323 = vector.extract_strided_slice %217 {offsets = [24, 0], sizes = [8, 32], strides = [1, 1]} : vector<32x32xbf16> to vector<8x32xbf16>
    %cst_93 = arith.constant dense<0.000000e+00> : vector<16x32xf32>
    %324 = tpu.matmul %322, %323, %cst_93 {dimension_numbers = #tpu.dot_dimension_numbers<[1], [0], [0], [1], [0, 0, 1, 1], [], []>} : vector<16x8xbf16>, vector<8x32xbf16>, vector<16x32xf32> -> vector<16x32xf32>
    %325 = arith.addf %302, %324 : vector<16x32xf32>
    %326 = vector.broadcast %221 : vector<1x32xf32> to vector<16x32xf32>
    %327 = arith.addf %325, %326 : vector<16x32xf32>
    %328 = arith.addf %327, %208 : vector<16x32xf32>
    %cst_94 = arith.constant dense<0.000000e+00> : vector<16xf32>
    %329 = vector.multi_reduction <add>, %328, %cst_94 [1] : vector<16x32xf32> to vector<16xf32>
    %330 = vector.shape_cast %329 : vector<16xf32> to vector<16x1xf32>
    %cst_95 = arith.constant 3.200000e+01 : f32
    %331 = vector.broadcast %cst_95 : f32 to vector<16x1xf32>
    %332 = arith.divf %330, %331 : vector<16x1xf32>
    %333 = vector.broadcast %332 : vector<16x1xf32> to vector<16x32xf32>
    %334 = arith.subf %328, %333 : vector<16x32xf32>
    %335 = arith.mulf %334, %334 : vector<16x32xf32>
    %cst_96 = arith.constant dense<0.000000e+00> : vector<16xf32>
    %336 = vector.multi_reduction <add>, %335, %cst_96 [1] : vector<16x32xf32> to vector<16xf32>
    %337 = vector.shape_cast %336 : vector<16xf32> to vector<16x1xf32>
    %cst_97 = arith.constant 3.200000e+01 : f32
    %338 = vector.broadcast %cst_97 : f32 to vector<16x1xf32>
    %339 = arith.divf %337, %338 : vector<16x1xf32>
    %cst_98 = arith.constant 9.99999996E-13 : f32
    %340 = vector.broadcast %cst_98 : f32 to vector<16x1xf32>
    %341 = arith.addf %339, %340 : vector<16x1xf32>
    %342 = math.rsqrt %341 : vector<16x1xf32>
    %343 = vector.broadcast %342 : vector<16x1xf32> to vector<16x32xf32>
    %344 = arith.mulf %334, %343 : vector<16x32xf32>
    %345 = vector.broadcast %222 : vector<1x32xf32> to vector<16x32xf32>
    %346 = arith.mulf %344, %345 : vector<16x32xf32>
    %347 = vector.broadcast %223 : vector<1x32xf32> to vector<16x32xf32>
    %348 = arith.addf %346, %347 : vector<16x32xf32>
    %349 = arith.truncf %348 : vector<16x32xf32> to vector<16x32xbf16>
    %cst_99 = arith.constant dense<0.000000e+00> : vector<16x64xf32>
    %350 = tpu.matmul %349, %218, %cst_99 {dimension_numbers = #tpu.dot_dimension_numbers<[1], [0], [0], [1], [0, 0, 1, 1], [], []>} : vector<16x32xbf16>, vector<32x64xbf16>, vector<16x64xf32> -> vector<16x64xf32>
    %351 = vector.broadcast %225 : vector<1x64xf32> to vector<16x64xf32>
    %352 = arith.addf %350, %351 : vector<16x64xf32>
    %cst_100 = arith.constant 5.000000e-01 : f32
    %353 = vector.broadcast %cst_100 : f32 to vector<16x64xf32>
    %354 = arith.mulf %353, %352 : vector<16x64xf32>
    %cst_101 = arith.constant 4.471500e-02 : f32
    %355 = vector.broadcast %cst_101 : f32 to vector<16x64xf32>
    %356 = arith.mulf %355, %352 : vector<16x64xf32>
    %357 = arith.mulf %356, %352 : vector<16x64xf32>
    %358 = arith.mulf %357, %352 : vector<16x64xf32>
    %359 = arith.addf %352, %358 : vector<16x64xf32>
    %cst_102 = arith.constant 0.797884583 : f32
    %360 = vector.broadcast %cst_102 : f32 to vector<16x64xf32>
    %361 = arith.mulf %360, %359 : vector<16x64xf32>
    %362 = math.tanh %361 : vector<16x64xf32>
    %cst_103 = arith.constant 1.000000e+00 : f32
    %363 = vector.broadcast %cst_103 : f32 to vector<16x64xf32>
    %364 = arith.addf %363, %362 : vector<16x64xf32>
    %365 = arith.mulf %354, %364 : vector<16x64xf32>
    %366 = arith.truncf %365 : vector<16x64xf32> to vector<16x64xbf16>
    %cst_104 = arith.constant dense<0.000000e+00> : vector<16x32xf32>
    %367 = tpu.matmul %366, %219, %cst_104 {dimension_numbers = #tpu.dot_dimension_numbers<[1], [1], [0], [0], [0, 0, 1, 0], [], []>} : vector<16x64xbf16>, vector<32x64xbf16>, vector<16x32xf32> -> vector<16x32xf32>
    %368 = vector.broadcast %224 : vector<1x32xf32> to vector<16x32xf32>
    %369 = arith.addf %367, %368 : vector<16x32xf32>
    %370 = arith.addf %369, %348 : vector<16x32xf32>
    %cst_105 = arith.constant dense<0.000000e+00> : vector<16xf32>
    %371 = vector.multi_reduction <add>, %370, %cst_105 [1] : vector<16x32xf32> to vector<16xf32>
    %372 = vector.shape_cast %371 : vector<16xf32> to vector<16x1xf32>
    %cst_106 = arith.constant 3.200000e+01 : f32
    %373 = vector.broadcast %cst_106 : f32 to vector<16x1xf32>
    %374 = arith.divf %372, %373 : vector<16x1xf32>
    %375 = vector.broadcast %374 : vector<16x1xf32> to vector<16x32xf32>
    %376 = arith.subf %370, %375 : vector<16x32xf32>
    %377 = arith.mulf %376, %376 : vector<16x32xf32>
    %cst_107 = arith.constant dense<0.000000e+00> : vector<16xf32>
    %378 = vector.multi_reduction <add>, %377, %cst_107 [1] : vector<16x32xf32> to vector<16xf32>
    %379 = vector.shape_cast %378 : vector<16xf32> to vector<16x1xf32>
    %cst_108 = arith.constant 3.200000e+01 : f32
    %380 = vector.broadcast %cst_108 : f32 to vector<16x1xf32>
    %381 = arith.divf %379, %380 : vector<16x1xf32>
    %cst_109 = arith.constant 9.99999996E-13 : f32
    %382 = vector.broadcast %cst_109 : f32 to vector<16x1xf32>
    %383 = arith.addf %381, %382 : vector<16x1xf32>
    %384 = math.rsqrt %383 : vector<16x1xf32>
    %385 = vector.broadcast %384 : vector<16x1xf32> to vector<16x32xf32>
    %386 = arith.mulf %376, %385 : vector<16x32xf32>
    %387 = vector.broadcast %226 : vector<1x32xf32> to vector<16x32xf32>
    %388 = arith.mulf %386, %387 : vector<16x32xf32>
    %389 = vector.broadcast %227 : vector<1x32xf32> to vector<16x32xf32>
    %390 = arith.addf %388, %389 : vector<16x32xf32>
    %c2 = arith.constant 2 : index
    %c0_110 = arith.constant 0 : index
    %c0_111 = arith.constant 0 : index
    %391 = vector.load %arg8[%c2, %c0_110, %c0_111] : memref<3x16x32xf32, #tpu.memory_space<vmem>>, vector<1x16x32xf32>
    %392 = vector.shape_cast %391 : vector<1x16x32xf32> to vector<16x32xf32>
    %393 = vector.shape_cast %390 : vector<16x32xf32> to vector<1x16x32xf32>
    tpu.vector_store %arg8[%c2, %c0_110, %c0_111], %393 {strides = array<i32>} : memref<3x16x32xf32, #tpu.memory_space<vmem>>, vector<1x16x32xf32>,
    %c0_112 = arith.constant 0 : index
    %c0_113 = arith.constant 0 : index
    %394 = vector.load %arg5[%c0_112, %c0_113] : memref<32x160xbf16, #tpu.memory_space<vmem>>, vector<32x160xbf16>
    %395 = vector.extract_strided_slice %394 {offsets = [0, 0], sizes = [32, 32], strides = [1, 1]} : vector<32x160xbf16> to vector<32x32xbf16>
    %396 = vector.extract_strided_slice %394 {offsets = [0, 32], sizes = [32, 128], strides = [1, 1]} : vector<32x160xbf16> to vector<32x128xbf16>
    %397 = tpu.iota {dimensions = array<i32: 0>} : vector<2x16xi32>
    %398 = tpu.iota {dimensions = array<i32: 1>} : vector<2x16xi32>
    %c8_i32 = arith.constant 8 : i32
    %399 = vector.broadcast %c8_i32 : i32 to vector<2x16xi32>
    %400 = arith.muli %397, %399 : vector<2x16xi32>
    %401 = arith.cmpi eq, %398, %400 : vector<2x16xi32>
    %cst_114 = arith.constant 1.000000e+00 : f32
    %cst_115 = arith.constant 0.000000e+00 : f32
    %402 = vector.broadcast %cst_114 : f32 to vector<2x16xf32>
    %403 = vector.broadcast %cst_115 : f32 to vector<2x16xf32>
    %404 = arith.select %401, %402, %403 : vector<2x16xi1>, vector<2x16xf32>
    %405 = arith.truncf %404 : vector<2x16xf32> to vector<2x16xbf16>
    %406 = arith.truncf %390 : vector<16x32xf32> to vector<16x32xbf16>
    %cst_116 = arith.constant dense<0.000000e+00> : vector<2x32xf32>
    %407 = tpu.matmul %405, %406, %cst_116 {dimension_numbers = #tpu.dot_dimension_numbers<[1], [0], [0], [1], [0, 0, 1, 1], [], []>} : vector<2x16xbf16>, vector<16x32xbf16>, vector<2x32xf32> -> vector<2x32xf32>
    %408 = arith.truncf %407 : vector<2x32xf32> to vector<2x32xbf16>
    %cst_117 = arith.constant dense<0.000000e+00> : vector<2x32xf32>
    %409 = tpu.matmul %408, %395, %cst_117 {dimension_numbers = #tpu.dot_dimension_numbers<[1], [0], [0], [1], [0, 0, 1, 1], [], []>} : vector<2x32xbf16>, vector<32x32xbf16>, vector<2x32xf32> -> vector<2x32xf32>
    %410 = vector.broadcast %3 : vector<1x32xf32> to vector<2x32xf32>
    %411 = arith.addf %409, %410 : vector<2x32xf32>
    %412 = math.tanh %411 : vector<2x32xf32>
    %413 = arith.truncf %412 : vector<2x32xf32> to vector<2x32xbf16>
    %cst_118 = arith.constant dense<0.000000e+00> : vector<2x128xf32>
    %414 = tpu.matmul %413, %396, %cst_118 {dimension_numbers = #tpu.dot_dimension_numbers<[1], [0], [0], [1], [0, 0, 1, 1], [], []>} : vector<2x32xbf16>, vector<32x128xbf16>, vector<2x128xf32> -> vector<2x128xf32>
    %415 = vector.broadcast %4 : vector<1x128xf32> to vector<2x128xf32>
    %416 = arith.addf %414, %415 : vector<2x128xf32>
    %c0_119 = arith.constant 0 : index
    %c0_120 = arith.constant 0 : index
    %417 = vector.load %arg9[%c0_119, %c0_120] : memref<2x128xf32, #tpu.memory_space<vmem>>, vector<2x128xf32>
    tpu.vector_store %arg9[%c0_119, %c0_120], %416 {strides = array<i32>} : memref<2x128xf32, #tpu.memory_space<vmem>>, vector<2x128xf32>,
    %cst_121 = arith.constant dense<0xFF800000> : vector<2xf32>
    %418 = vector.multi_reduction <maximumf>, %416, %cst_121 [1] : vector<2x128xf32> to vector<2xf32>
    %419 = vector.shape_cast %418 : vector<2xf32> to vector<2x1xf32>
    %420 = vector.broadcast %419 : vector<2x1xf32> to vector<2x128xf32>
    %421 = arith.subf %416, %420 : vector<2x128xf32>
    %422 = math.exp %421 : vector<2x128xf32>
    %cst_122 = arith.constant dense<0.000000e+00> : vector<2xf32>
    %423 = vector.multi_reduction <add>, %422, %cst_122 [1] : vector<2x128xf32> to vector<2xf32>
    %424 = vector.shape_cast %423 : vector<2xf32> to vector<2x1xf32>
    %425 = math.log %424 : vector<2x1xf32>
    %426 = arith.addf %419, %425 : vector<2x1xf32>
    %c0_123 = arith.constant 0 : index
    %c0_124 = arith.constant 0 : index
    %427 = vector.load %arg7[%c0_123, %c0_124] : memref<2x128xf32, #tpu.memory_space<vmem>>, vector<2x128xf32>
    %428 = arith.mulf %416, %427 : vector<2x128xf32>
    %cst_125 = arith.constant dense<0.000000e+00> : vector<2xf32>
    %429 = vector.multi_reduction <add>, %428, %cst_125 [1] : vector<2x128xf32> to vector<2xf32>
    %430 = vector.shape_cast %429 : vector<2xf32> to vector<2x1xf32>
    %431 = arith.subf %426, %430 : vector<2x1xf32>
    %432 = vector.shape_cast %431 : vector<2x1xf32> to vector<1x2x1xf32>
    %cst_126 = arith.constant dense<0.000000e+00> : vector<1xf32>
    %433 = vector.multi_reduction <add>, %432, %cst_126 [1, 2] : vector<1x2x1xf32> to vector<1xf32>
    %434 = vector.shape_cast %433 : vector<1xf32> to vector<1x1x1xf32>
    %435 = vector.extract %434[0, 0, 0] : f32 from vector<1x1x1xf32>
    %436 = vector.broadcast %435 : f32 to vector<1x1xf32>
    %cst_127 = arith.constant 2.000000e+00 : f32
    %437 = vector.broadcast %cst_127 : f32 to vector<1x1xf32>
    %438 = arith.divf %436, %437 : vector<1x1xf32>
    %c0_128 = arith.constant 0 : index
    %c0_129 = arith.constant 0 : index
    %439 = vector.load %arg10[%c0_128, %c0_129] : memref<1x1xf32, #tpu.memory_space<vmem>>, vector<1x1xf32>
    tpu.vector_store %arg10[%c0_128, %c0_129], %438 {strides = array<i32>} : memref<1x1xf32, #tpu.memory_space<vmem>>, vector<1x1xf32>,
    return
  }
  func.func @transform_0(%arg0: i32) -> (i32, i32) {
    %c0_i32 = arith.constant 0 : i32
    %c0_i32_0 = arith.constant 0 : i32
    %c0_i32_1 = arith.constant 0 : i32
    return %c0_i32, %c0_i32_0 : i32, i32
  }
  func.func @transform_1(%arg0: i32) -> (i32, i32) {
    %c0_i32 = arith.constant 0 : i32
    %c0_i32_0 = arith.constant 0 : i32
    %c0_i32_1 = arith.constant 0 : i32
    return %c0_i32, %c0_i32_0 : i32, i32
  }
  func.func @transform_2(%arg0: i32) -> (i32, i32, i32) {
    %c0_i32 = arith.constant 0 : i32
    %c0_i32_0 = arith.constant 0 : i32
    %c0_i32_1 = arith.constant 0 : i32
    %c0_i32_2 = arith.constant 0 : i32
    return %c0_i32, %c0_i32_0, %c0_i32_1 : i32, i32, i32
  }
  func.func @transform_3(%arg0: i32) -> (i32, i32, i32) {
    %c0_i32 = arith.constant 0 : i32
    %c0_i32_0 = arith.constant 0 : i32
    %c0_i32_1 = arith.constant 0 : i32
    %c0_i32_2 = arith.constant 0 : i32
    return %c0_i32, %c0_i32_0, %c0_i32_1 : i32, i32, i32
  }
  func.func @transform_4(%arg0: i32) -> (i32, i32) {
    %c0_i32 = arith.constant 0 : i32
    %c0_i32_0 = arith.constant 0 : i32
    %c0_i32_1 = arith.constant 0 : i32
    return %c0_i32, %c0_i32_0 : i32, i32
  }
  func.func @transform_5(%arg0: i32) -> (i32, i32) {
    %c0_i32 = arith.constant 0 : i32
    %c0_i32_0 = arith.constant 0 : i32
    %c0_i32_1 = arith.constant 0 : i32
    return %c0_i32, %c0_i32_0 : i32, i32
  }
  func.func @transform_6(%arg0: i32) -> (i32, i32) {
    %c0_i32 = arith.constant 0 : i32
    %c0_i32_0 = arith.constant 0 : i32
    %c0_i32_1 = arith.constant 0 : i32
    return %c0_i32, %c0_i32_0 : i32, i32
  }
  func.func @transform_7(%arg0: i32) -> (i32, i32, i32) {
    %c0_i32 = arith.constant 0 : i32
    %c0_i32_0 = arith.constant 0 : i32
    %c0_i32_1 = arith.constant 0 : i32
    %c0_i32_2 = arith.constant 0 : i32
    return %c0_i32, %c0_i32_0, %c0_i32_1 : i32, i32, i32
  }
  func.func @transform_8(%arg0: i32) -> (i32, i32) {
    %c0_i32 = arith.constant 0 : i32
    %c0_i32_0 = arith.constant 0 : i32
    %c0_i32_1 = arith.constant 0 : i32
    return %c0_i32, %c0_i32_0 : i32, i32
  }
  func.func @transform_9(%arg0: i32) -> (i32, i32) {
    %c0_i32 = arith.constant 0 : i32
    %c0_i32_0 = arith.constant 0 : i32
    %c0_i32_1 = arith.constant 0 : i32
    return %c0_i32, %c0_i32_0 : i32, i32
  }
}

</mosaic_0001>

<bundles_post_ra>
// kernel: tpu_custom_call.1
= control target key start
LH: loop header
LB: loop body
LE: loop exit
PB: predicated region body
PF: predicated region fallthrough
CT: control target
= control target key end

     0   :  { %15 = vsyncpa [#allocation3], 0  ;;  %s3658_s0 = inlined_call_operand.hbm [shape: f32[16,32], index: 0, kind: input, shape index: {}]   ;;  %s3659_s1 = inlined_call_operand.vmem [shape: f32[16,16], index: 1, kind: input, shape index: {}]   ;;  %s3660_s2 = inlined_call_operand.hbm [shape: bf16[2,32,256], index: 2, kind: input, shape index: {}]   ;;  %s3661_s3 = inlined_call_operand.vmem [shape: f32[2,3,128], index: 3, kind: input, shape index: {}]   ;;  %s3662_s4 = inlined_call_operand.hbm [shape: bf16[32,160], index: 4, kind: input, shape index: {}]   ;;  %s3663_s5 = inlined_call_operand.vmem [shape: f32[2,128], index: 5, kind: input, shape index: {}]   ;;  %s3664_s6 = inlined_call_operand.vmem [shape: f32[2,128], index: 6, kind: input, shape index: {}]   ;;  %s3665_s7 = inlined_call_operand.hbm [shape: f32[3,16,32], index: 7, kind: output, shape index: {0}]   ;;  %s3666_s8 = inlined_call_operand.hbm [shape: f32[2,128], index: 8, kind: output, shape index: {1}]   ;;  %s3667_s9 = inlined_call_operand.hbm [shape: f32[1,1], index: 9, kind: output, shape index: {2}]  }
   0x1   :  { %16 = vsyncpa [#allocation6], 0 }
   0x2   :  { %17 = vsyncpa [#allocation4], 0 }
   0x3   :  { %18 = vsyncpa [#allocation10], 0  ;;  %s3007_s30 = smov [#allocation5]   ;;  %s3008_s11 = smov [#allocation2]  }
   0x4   :  { %s38_s10 = sshll.u32 %s3007_s30, 4  ;;  %s24_s12 = sshll.u32 %s3008_s11, 4  ;;  %s39_s10 = int_to_ptr.vmem [resolvable:$true] %s38_s10  ;;  %s3079_s12 = int_to_ptr.vmem [resolvable:$true] %s24_s12 }
   0x5   :  { %s2867_s15 = scalar_lea.hbm %s3660_s2, 1024 }
   0x6   :  { %p2868_p0 = scmp.ne.s32.totalorder %s3660_s2, %s2867_s15  ;;  %p2871_p1 = scmp.lt.u32.totalorder %s2867_s15, %s3660_s2 }
   0x8   :  { %p2873_p2 = pnand %p2871_p1, %p2868_p0 }
   0xa   :  { %2876 = shalt.err (!%p2873_p2)
}
   0xb   :  { %s2877_s20 = scalar_lea.vmem %s39_s10, 1024  ;;  %p2882_p4 = scmp.lt.s32.totalorder %s39_s10, %s39_s10 }
   0xc   :  { %p2878_p3 = scmp.ne.s32.totalorder %s39_s10, %s2877_s20  ;;  %p2883_p5 = scmp.lt.s32.totalorder %s2877_s20, %s2877_s20 }
   0xe   :  { %p2884_p6 = por %p2883_p5, %p2882_p4 }
  0x10   :  { %p2885_p7 = pnand %p2884_p6, %p2878_p3 }
  0x12   :  { %2888 = shalt.err (!%p2885_p7)
}
  0x13   :  { %s3009_s21 = smov 128   ;;  %s3010_s22 = smov 8  }
  0x14   :  { %44 = dma.hbm_to_vmem [thread:$0]  %s3660_s2, 1024, %s39_s10, [#allocation6], %s3009_s21, %s3009_s21, %s3010_s22  }
  0x15   :  { %s2889_s27 = scalar_lea.hbm %s3658_s0, 256 }
  0x16   :  { %p2890_p8 = scmp.ne.s32.totalorder %s3658_s0, %s2889_s27  ;;  %p2893_p9 = scmp.lt.u32.totalorder %s2889_s27, %s3658_s0 }
  0x18   :  { %p2895_p10 = pnand %p2893_p9, %p2890_p8 }
  0x1a   :  { %2898 = shalt.err (!%p2895_p10)
}
  0x1b   :  { %s2899_s13 = scalar_lea.vmem %s3079_s12, 256  ;;  %p2904_p12 = scmp.lt.s32.totalorder %s3079_s12, %s3079_s12 }
  0x1c   :  { %p2900_p11 = scmp.ne.s32.totalorder %s3079_s12, %s2899_s13  ;;  %p2905_p13 = scmp.lt.s32.totalorder %s2899_s13, %s2899_s13 }
  0x1e   :  { %p2906_p0 = por %p2905_p13, %p2904_p12 }
  0x20   :  { %p2907_p1 = pnand %p2906_p0, %p2900_p11 }
  0x22   :  { %2910 = shalt.err (!%p2907_p1)
}
  0x23   :  { %30 = dma.hbm_to_vmem [thread:$0]  %s3658_s0, 256, %s3079_s12, [#allocation3], %s3009_s21, %s3009_s21, %s3010_s22  }
  0x24   :  { %s3011_s14 = smov [#allocation7]   ;;  %s2911_s18 = scalar_lea.hbm %s3662_s4, 512 }
  0x25   :  { %s52_s15 = sshll.u32 %s3011_s14, 4  ;;  %p2912_p2 = scmp.ne.s32.totalorder %s3662_s4, %s2911_s18  ;;  %s53_s15 = int_to_ptr.vmem [resolvable:$true] %s52_s15 }
  0x26   :  { %p2915_p3 = scmp.lt.u32.totalorder %s2911_s18, %s3662_s4 }
  0x28   :  { %p2917_p4 = pnand %p2915_p3, %p2912_p2 }
  0x2a   :  { %2920 = shalt.err (!%p2917_p4)
}
  0x2b   :  { %s2921_s25 = scalar_lea.vmem %s53_s15, 512  ;;  %p2926_p6 = scmp.lt.s32.totalorder %s53_s15, %s53_s15 }
  0x2c   :  { %p2922_p5 = scmp.ne.s32.totalorder %s53_s15, %s2921_s25  ;;  %p2927_p7 = scmp.lt.s32.totalorder %s2921_s25, %s2921_s25 }
  0x2e   :  { %p2928_p8 = por %p2927_p7, %p2926_p6 }
  0x30   :  { %p2929_p9 = pnand %p2928_p8, %p2922_p5 }
  0x32   :  { %2932 = shalt.err (!%p2929_p9)
}
  0x33   :  { %58 = dma.hbm_to_vmem [thread:$0]  %s3662_s4, 512, %s53_s15, [#allocation6], %s3009_s21, %s3009_s21, %s3010_s22  }
  0x34   :  { %2999 = dma.done.wait [#allocation3], 256  }
  0x35   :  { %3000 = vsyncadd [#allocation3], 4294967040 }
  0x36   :  { %3001 = dma.done.wait [#allocation6], 1536  }
  0x37   :  { %3002 = vsyncadd [#allocation6], 4294965760  ;;  %vm76_vm0 = vcmask 261120   ;;  %v74_v0 = vld [vmem:[#allocation2] sm:$0xff]  ;;  %v75_v1 = vld [vmem:[#allocation2 + $0x8] sm:$0xff]  ;;  %v104_v4 = vlaneseq  ;;  %s3012_s4 = smov 96  }
  0x38   :  { %v77_v2 = vsel %vm76_vm0, %v74_v0, 0.0  ;;  %v80_v3 = vsel %vm76_vm0, %v75_v1, 0.0  ;;  %v73_v6 = vld [vmem:[%s3663_s5] sm:$0x3]  ;;  %v3149_v19 = vld [vmem:[#allocation5] sm:$0xff]  ;;  %v3151_v20 = vld [vmem:[#allocation5 + $0x8] sm:$0xff] }
  0x39   :  { %78 = vadd.xlane.f32.xlu0 %v77_v2  ;;  %v3134_v5 = vshrl.u32 %v104_v4, 7  ;;  %v2378_v21 = vcombine.low %v3149_v19, %v3151_v20  ;;  %v3013_v22 = vmov 0.0   ;;  %v3158_v23 = vld [vmem:[#allocation5 + $0x10] sm:$0xff]  ;;  %v3160_v24 = vld [vmem:[#allocation5 + $0x18] sm:$0xff]  ;;  %vm3014_vm1 = vmmov 0   ;;  %s3015_s30 = smov 88  }
  0x3a   :  { %2506 = vmatprep.subr.bf16.mxu0 %v3013_v22  ;;  %2514 = vmatprep.subr.bf16.mxu1 %v3013_v22  ;;  %v2379_v25 = vcombine.low %v3158_v23, %v3160_v24  ;;  %v3187_v42 = vld [vmem:[%s3661_s3] sm:$0x7]  ;;  %s3016_s11 = smov 120   ;;  %vm190_vm2 = vcmask 64512   ;;  %vm242_vm3 = vcmask 130048   ;;  %v3218_v61 = vld [vmem:[%s3659_s1 + $0x8] sm:$0xff] }
  0x3b   :  { %v3140_v7 = vsub.s32 0, %v3134_v5  ;;  %2507 = vmatpush3.bf16.msra.mxu0 %v2378_v21  ;;  %2510 = vmatprep.mubr.msk.bf16.mxu0 %vm3014_vm1, %v3013_v22  ;;  %v3213_v57 = vld [vmem:[%s3659_s1] sm:$0xff]  ;;  %s3017_s15 = smov 56   ;;  %s3018_s16 = smov 64   ;;  %vm446_vm4 = vcmask 1043456   ;;  %vm1025_vm5 = vcmask 523264  }
  0x3c   :  { %2508 = vmatprep.subr.bf16.mxu0 %v3013_v22  ;;  %2516 = vmatprep.mubr.msk.bf16.mxu1 %vm3014_vm1, %v3013_v22  ;;  %s3019_s17 = smov 32   ;;  %s3020_s18 = smov 112   ;;  %vm2249_vm7 = vcmask 785408   ;;  %vm2298_vm8 = vcmask 1041408   ;;  %vm2317_vm9 = vcmask 1024  }
  0x3d   :  { %81 = vadd.xlane.f32.xlu0 %v80_v3  ;;  %v3143_v8 = vrot.slane %v73_v6, %v3140_v7  ;;  %v129_v43 = vrot.slane %v3187_v42, %v3140_v7  ;;  %s3021_s19 = smov 80   ;;  %s3022_s20 = smov 72  }
  0x3e   :  { %s3023_s23 = smov 104   ;;  %s3024_s24 = smov 48  }
  0x3f   :  { %2509 = vmatpush3.bf16.msra.mxu0 %v2379_v25  ;;  %s3025_s25 = smov 40  }
  0x40   :  { %2520 = vmatprep.subr.bf16.mxu0 %v3013_v22 }
  0x53   :  { %111 = vrot.lane.b32.xlu0 %v3143_v8, %s3012_s4 }
  0xc6   :  { %v79_v9 = vpop.xlane.xlu0 %78 }
  0xc7   :  { %v84_v10 = vmul.f32 0.03125, %v79_v9 }
  0xc9   :  { %v86_v11 = vsub.f32 %v74_v0, %v84_v10 }
  0xca   :  { %v82_v12 = vpop.xlane.xlu0 %81 }
  0xcb   :  { %v85_v13 = vmul.f32 0.03125, %v82_v12  ;;  %v88_v14 = vmul.f32 %v86_v11, %v86_v11 }
  0xcd   :  { %v87_v15 = vsub.f32 %v75_v1, %v85_v13  ;;  %v90_v16 = vsel %vm76_vm0, %v88_v14, 0.0 }
  0xce   :  { %91 = vadd.xlane.f32.xlu1 %v90_v16  ;;  %v112_v34 = vpop.permute.xlu0 %111 }
  0xcf   :  { %v89_v17 = vmul.f32 %v87_v15, %v87_v15 }
  0xd1   :  { %v93_v18 = vsel %vm76_vm0, %v89_v17, 0.0 }
  0xd2   :  { %94 = vadd.xlane.f32.xlu1 %v93_v18 }
 0x15b   :  { %v92_v26 = vpop.xlane.xlu1 %91 }
 0x15c   :  { %v96_v27 = vmul.f32 0.03125, %v92_v26 }
 0x15e   :  { %v98_v28 = vadd.f32 1e-12, %v96_v27 }
 0x15f   :  { %v95_v29 = vpop.xlane.xlu1 %94 }
 0x160   :  { %2766 = vrsqrt.f32 %v98_v28  ;;  %v97_v30 = vmul.f32 0.03125, %v95_v29 }
 0x162   :  { %v99_v31 = vadd.f32 1e-12, %v97_v30 }
 0x164   :  { %2768 = vrsqrt.f32 %v99_v31 }
 0x16a   :  { %v2767_v32 = vpop.eup %2766 }
 0x16b   :  { %v102_v33 = vmul.f32 %v2767_v32, %v86_v11 }
 0x16d   :  { %v108_v35 = vmul.f32 %v3143_v8, %v102_v33 }
 0x16e   :  { %v2769_v36 = vpop.eup %2768 }
 0x16f   :  { %v103_v37 = vmul.f32 %v2769_v36, %v87_v15  ;;  %v3170_v38 = vadd.f32 %v112_v34, %v108_v35 }
 0x171   :  { %v109_v39 = vmul.f32 %v3143_v8, %v103_v37  ;;  %116 = vst.msk [vmem:[#allocation8] sm:$0xff] %vm76_vm0, %v3170_v38 }
 0x173   :  { %v3175_v40 = vadd.f32 %v112_v34, %v109_v39 }
 0x175   :  { %117 = vst.msk [vmem:[#allocation8 + $0x8] sm:$0xff] %vm76_vm0, %v3175_v40  ;;  %v125_v41 = vpack.c.bf16 %v3175_v40, %v3170_v38 }
 0x177   :  { %2511 = vmatmul.mubr.msk.bf16.vlgmr.msra.gmra.mrb[0].mxu0 %vm76_vm0, %v125_v41 }
 0x178   :  { %2522 = vmatprep.mubr.msk.bf16.mxu0 %vm3014_vm1, %v3013_v22 }
 0x24a   :  { %v179_v44 = vpop.f32.mrb[0].mxu0 }
 0x24b   :  { %v2512_v45 = vpop.f32.mrb[1].mxu0  ;;  %v180_v47 = vadd.f32 %v179_v44, %v129_v43 }
 0x24c   :  { %v182_v46 = vpop.f32.mrb[2].mxu0 }
 0x24d   :  { %v183_v48 = vadd.f32 %v182_v46, %v129_v43  ;;  %v2513_v49 = vpop.f32.mrb[3].mxu0  ;;  %v2385_v46 = vcombine.low %v3151_v20, %v3151_v20 }
 0x24f   :  { %v3191_v50 = vpack.c.bf16 %v183_v48, %v180_v47 }
 0x251   :  { %188 = vrot.lane.b32.xlu1 %v3191_v50, %s3012_s4 }
 0x255   :  { %316 = vrot.lane.b32.xlu1 %v3191_v50, %s3015_s30 }
 0x259   :  { %314 = vrot.lane.b32.xlu1 %v3191_v50, %s3016_s11 }
 0x2c3   :  { %v189_v51 = vpop.permute.xlu1 %188 }
 0x2c4   :  { %v195_v52 = vsel %vm190_vm2, %v189_v51, 0 }
 0x2c5   :  { %2515 = vmatpush3.bf16.xpose.msra.mxu1 %v195_v52 }
 0x2c6   :  { %2526 = vmatprep.subr.bf16.mxu1 %v3013_v22 }
 0x2c7   :  { %v317_v53 = vpop.permute.xlu1 %316 }
 0x2c8   :  { %v322_v54 = vsel %vm190_vm2, %v317_v53, 0 }
 0x2cb   :  { %v315_v55 = vpop.permute.xlu1 %314 }
 0x2cc   :  { %2517 = vmatmul.mubr.msk.bf16.vlgmr.msra.gmra.mrb[0].mxu1 %vm190_vm2, %v3191_v50 }
 0x2cd   :  { %2527 = vmatpush3.bf16.xpose.msra.mxu1 %v322_v54  ;;  %2528 = vmatprep.mubr.msk.bf16.mxu1 %vm3014_vm1, %v3013_v22 }
 0x2ce   :  { %2538 = vmatprep.subr.bf16.mxu1 %v3013_v22 }
 0x2d4   :  { %2529 = vmatmul.mubr.msk.bf16.vlgmr.msra.gmra.mrb[4].mxu1 %vm190_vm2, %v315_v55 }
 0x2d5   :  { %2540 = vmatprep.mubr.msk.bf16.mxu1 %vm3014_vm1, %v3013_v22 }
 0x39f   :  { %v231_v56 = vpop.f32.mrb[0].mxu1 }
 0x3a0   :  { %v238_v58 = vmul.f32 0.35355338, %v231_v56  ;;  %v2518_v59 = vpop.f32.mrb[1].mxu1 }
 0x3a1   :  { %v234_v60 = vpop.f32.mrb[2].mxu1 }
 0x3a2   :  { %v239_v62 = vmul.f32 0.35355338, %v234_v60  ;;  %v2519_v63 = vpop.f32.mrb[3].mxu1  ;;  %v240_v0 = vadd.f32 %v238_v58, %v3213_v57 }
 0x3a4   :  { %v243_v1 = vsel %vm242_vm3, %v240_v0, -inf  ;;  %v241_v2 = vadd.f32 %v239_v62, %v3218_v61 }
 0x3a5   :  { %244 = vmax.xlane.f32.xlu0 %v243_v1 }
 0x3a6   :  { %v246_v3 = vsel %vm242_vm3, %v241_v2, -inf }
 0x3a7   :  { %247 = vmax.xlane.f32.xlu1 %v246_v3  ;;  %v358_v6 = vpop.f32.mrb[4].mxu1 }
 0x3a8   :  { %v365_v9 = vmul.f32 0.35355338, %v358_v6  ;;  %v2530_v10 = vpop.f32.mrb[5].mxu1 }
 0x3a9   :  { %v361_v11 = vpop.f32.mrb[6].mxu1 }
 0x3aa   :  { %v366_v12 = vmul.f32 0.35355338, %v361_v11  ;;  %v2531_v13 = vpop.f32.mrb[7].mxu1  ;;  %v367_v14 = vadd.f32 %v365_v9, %v3213_v57 }
 0x3ac   :  { %v369_v15 = vsel %vm242_vm3, %v367_v14, -inf  ;;  %v368_v16 = vadd.f32 %v366_v12, %v3218_v61 }
 0x3ad   :  { %370 = vmax.xlane.f32.xlu0 %v369_v15 }
 0x3ae   :  { %v372_v17 = vsel %vm242_vm3, %v368_v16, -inf }
 0x3b1   :  { %373 = vmax.xlane.f32.xlu0 %v372_v17 }
 0x432   :  { %v245_v18 = vpop.xlane.xlu0 %244 }
 0x433   :  { %v249_v21 = vsub.f32 %v240_v0, %v245_v18 }
 0x434   :  { %v248_v25 = vpop.xlane.xlu1 %247 }
 0x435   :  { %v251_v26 = vmul.f32 1.442695, %v249_v21  ;;  %v250_v27 = vsub.f32 %v241_v2, %v248_v25 }
 0x437   :  { %2770 = vpow2.f32 %v251_v26  ;;  %v253_v28 = vmul.f32 1.442695, %v250_v27 }
 0x439   :  { %2772 = vpow2.f32 %v253_v28 }
 0x43a   :  { %v371_v29 = vpop.xlane.xlu0 %370 }
 0x43b   :  { %v375_v30 = vsub.f32 %v367_v14, %v371_v29 }
 0x43d   :  { %v377_v31 = vmul.f32 1.442695, %v375_v30 }
 0x43e   :  { %v374_v32 = vpop.xlane.xlu0 %373 }
 0x43f   :  { %2774 = vpow2.f32 %v377_v31  ;;  %v376_v33 = vsub.f32 %v368_v16, %v374_v32 }
 0x441   :  { %v2771_v34 = vpop.eup %2770  ;;  %v379_v35 = vmul.f32 1.442695, %v376_v33 }
 0x442   :  { %v255_v36 = vsel %vm242_vm3, %v2771_v34, 0.0 }
 0x443   :  { %v2773_v37 = vpop.eup %2772  ;;  %2776 = vpow2.f32 %v379_v35  ;;  %256 = vadd.xlane.f32.xlu0 %v255_v36 }
 0x444   :  { %v258_v39 = vsel %vm242_vm3, %v2773_v37, 0.0 }
 0x445   :  { %259 = vadd.xlane.f32.xlu1 %v258_v39 }
 0x449   :  { %v2775_v41 = vpop.eup %2774 }
 0x44a   :  { %v381_v43 = vsel %vm242_vm3, %v2775_v41, 0.0 }
 0x44b   :  { %382 = vadd.xlane.f32.xlu0 %v381_v43  ;;  %v2387_v43 = vcombine.low %v3149_v19, %v3149_v19 }
 0x44d   :  { %v2777_v44 = vpop.eup %2776 }
 0x44e   :  { %v384_v45 = vsel %vm242_vm3, %v2777_v44, 0.0 }
 0x44f   :  { %385 = vadd.xlane.f32.xlu1 %v384_v45 }
 0x460   :  { %392 = vrot.lane.b32.xlu1 %v3191_v50, %s3017_s15 }
 0x461   :  { %266 = vrot.lane.b32.xlu0 %v3191_v50, %s3018_s16 }
 0x464   :  { %441 = vrot.lane.b32.xlu1 %v2385_v46, %s3019_s17 }
 0x465   :  { %541 = vrot.lane.b32.xlu0 %v3191_v50, %s3020_s18 }
 0x468   :  { %543 = vrot.lane.b32.xlu1 %v3191_v50, %s3021_s19 }
 0x4d0   :  { %v257_v47 = vpop.xlane.xlu0 %256 }
 0x4d1   :  { %2778 = vrcp.f32 %v257_v47 }
 0x4d2   :  { %v260_v48 = vpop.xlane.xlu1 %259 }
 0x4d3   :  { %2780 = vrcp.f32 %v260_v48 }
 0x4d8   :  { %v383_v49 = vpop.xlane.xlu0 %382 }
 0x4d9   :  { %2782 = vrcp.f32 %v383_v49 }
 0x4db   :  { %v2779_v51 = vpop.eup %2778 }
 0x4dc   :  { %v267_v52 = vpop.permute.xlu0 %266  ;;  %v386_v53 = vpop.xlane.xlu1 %385  ;;  %v263_v55 = vmul.f32 %v2779_v51, %v2771_v34 }
 0x4dd   :  { %v2781_v54 = vpop.eup %2780  ;;  %2784 = vrcp.f32 %v386_v53  ;;  %2521 = vmatpush3.bf16.msra.mxu0 %v267_v52 }
 0x4de   :  { %v264_v56 = vmul.f32 %v2781_v54, %v2773_v37  ;;  %2532 = vmatprep.subr.bf16.mxu0 %v3013_v22 }
 0x4e0   :  { %v393_v58 = vpop.permute.xlu1 %392  ;;  %v265_v59 = vpack.c.bf16 %v264_v56, %v263_v55  ;;  %v542_v25 = vpop.permute.xlu0 %541 }
 0x4e2   :  { %2523 = vmatmul.mubr.msk.bf16.vlgmr.msra.gmra.mrb[4].mxu0 %vm242_vm3, %v265_v59 }
 0x4e3   :  { %2533 = vmatpush3.bf16.msra.mxu0 %v393_v58  ;;  %2534 = vmatprep.mubr.msk.bf16.mxu0 %vm3014_vm1, %v3013_v22  ;;  %v2783_v62 = vpop.eup %2782 }
 0x4e4   :  { %v442_v60 = vpop.permute.xlu1 %441  ;;  %2544 = vmatprep.subr.bf16.mxu0 %v3013_v22  ;;  %v389_v1 = vmul.f32 %v2783_v62, %v2775_v41 }
 0x4e5   :  { %v448_v63 = vsel %vm446_vm4, %v442_v60, 0 }
 0x4e6   :  { %2539 = vmatpush3.bf16.msra.mxu1 %v448_v63 }
 0x4e7   :  { %v2785_v0 = vpop.eup %2784  ;;  %2550 = vmatprep.subr.bf16.mxu1 %v3013_v22 }
 0x4e8   :  { %v390_v2 = vmul.f32 %v2785_v0, %v2777_v44  ;;  %v544_v15 = vpop.permute.xlu1 %543 }
 0x4e9   :  { %v549_v21 = vsel %vm190_vm2, %v544_v15, 0 }
 0x4ea   :  { %v391_v3 = vpack.c.bf16 %v390_v2, %v389_v1 }
 0x4ec   :  { %2535 = vmatmul.mubr.msk.bf16.vlgmr.msra.gmra.mrb[8].mxu0 %vm242_vm3, %v391_v3 }
 0x4ed   :  { %2546 = vmatprep.mubr.msk.bf16.mxu0 %vm3014_vm1, %v3013_v22 }
 0x5b5   :  { %v306_v6 = vpop.f32.mrb[4].mxu0 }
 0x5b6   :  { %v2524_v9 = vpop.f32.mrb[5].mxu0 }
 0x5b7   :  { %v309_v10 = vpop.f32.mrb[6].mxu0 }
 0x5b8   :  { %v313_v11 = vpack.c.bf16 %v309_v10, %v306_v6  ;;  %v2525_v12 = vpop.f32.mrb[7].mxu0 }
 0x5bf   :  { %v432_v13 = vpop.f32.mrb[8].mxu0 }
 0x5c0   :  { %v2536_v14 = vpop.f32.mrb[9].mxu0 }
 0x5c1   :  { %v435_v16 = vpop.f32.mrb[10].mxu0 }
 0x5c2   :  { %v439_v17 = vpack.c.bf16 %v435_v16, %v432_v13  ;;  %v2537_v18 = vpop.f32.mrb[11].mxu0 }
 0x5c4   :  { %2541 = vmatmul.mubr.msk.bf16.vlgmr.msra.gmra.mrb[8].mxu1 %vm190_vm2, %v439_v17 }
 0x5c5   :  { %2551 = vmatpush3.bf16.xpose.msra.mxu1 %v549_v21  ;;  %2552 = vmatprep.mubr.msk.bf16.mxu1 %vm3014_vm1, %v3013_v22 }
 0x5c6   :  { %2562 = vmatprep.subr.bf16.mxu1 %v3013_v22 }
 0x5cc   :  { %2553 = vmatmul.mubr.msk.bf16.vlgmr.msra.gmra.mrb[12].mxu1 %vm190_vm2, %v542_v25 }
 0x5cd   :  { %2564 = vmatprep.mubr.msk.bf16.mxu1 %vm3014_vm1, %v3013_v22 }
 0x697   :  { %v3261_v26 = vpop.f32.mrb[8].mxu1 }
 0x698   :  { %v2542_v27 = vpop.f32.mrb[9].mxu1 }
 0x699   :  { %v3263_v28 = vpop.f32.mrb[10].mxu1 }
 0x69a   :  { %v2543_v29 = vpop.f32.mrb[11].mxu1 }
 0x69f   :  { %v585_v30 = vpop.f32.mrb[12].mxu1 }
 0x6a0   :  { %v592_v31 = vmul.f32 0.35355338, %v585_v30  ;;  %v2554_v32 = vpop.f32.mrb[13].mxu1 }
 0x6a1   :  { %v588_v33 = vpop.f32.mrb[14].mxu1 }
 0x6a2   :  { %v593_v34 = vmul.f32 0.35355338, %v588_v33  ;;  %v2555_v35 = vpop.f32.mrb[15].mxu1  ;;  %v594_v36 = vadd.f32 %v592_v31, %v3213_v57 }
 0x6a4   :  { %v596_v37 = vsel %vm242_vm3, %v594_v36, -inf  ;;  %v595_v39 = vadd.f32 %v593_v34, %v3218_v61 }
 0x6a5   :  { %597 = vmax.xlane.f32.xlu1 %v596_v37 }
 0x6a6   :  { %v599_v41 = vsel %vm242_vm3, %v595_v39, -inf }
 0x6a7   :  { %600 = vmax.xlane.f32.xlu0 %v599_v41 }
 0x6b6   :  { %492 = vrot.lane.b32.xlu1 %v2387_v43, %s3019_s17 }
 0x6ba   :  { %721 = vrot.lane.b32.xlu1 %v3191_v50, %s3022_s20 }
 0x6be   :  { %719 = vrot.lane.b32.xlu1 %v3191_v50, %s3023_s23 }
 0x732   :  { %v598_v44 = vpop.xlane.xlu1 %597 }
 0x733   :  { %v602_v45 = vsub.f32 %v594_v36, %v598_v44  ;;  %v2391_v36 = vcombine.low %v3158_v23, %v3158_v23 }
 0x734   :  { %v601_v46 = vpop.xlane.xlu0 %600 }
 0x735   :  { %v604_v47 = vmul.f32 1.442695, %v602_v45  ;;  %v603_v48 = vsub.f32 %v595_v39, %v601_v46 }
 0x736   :  { %v493_v49 = vpop.permute.xlu1 %492 }
 0x737   :  { %2786 = vpow2.f32 %v604_v47  ;;  %v606_v51 = vmul.f32 1.442695, %v603_v48  ;;  %v498_v52 = vsel %vm446_vm4, %v493_v49, 0 }
 0x738   :  { %2545 = vmatpush3.bf16.msra.mxu0 %v498_v52 }
 0x739   :  { %2788 = vpow2.f32 %v606_v51  ;;  %2556 = vmatprep.subr.bf16.mxu0 %v3013_v22 }
 0x73a   :  { %v722_v2 = vpop.permute.xlu1 %721 }
 0x73b   :  { %2547 = vmatmul.mubr.msk.bf16.vlgmr.msra.gmra.mrb[12].mxu0 %vm190_vm2, %v313_v11  ;;  %v727_v6 = vsel %vm190_vm2, %v722_v2, 0 }
 0x73c   :  { %2558 = vmatprep.mubr.msk.bf16.mxu0 %vm3014_vm1, %v3013_v22 }
 0x73e   :  { %v720_v9 = vpop.permute.xlu1 %719 }
 0x741   :  { %v2787_v53 = vpop.eup %2786 }
 0x742   :  { %v608_v54 = vsel %vm242_vm3, %v2787_v53, 0.0 }
 0x743   :  { %v2789_v55 = vpop.eup %2788  ;;  %609 = vadd.xlane.f32.xlu0 %v608_v54 }
 0x744   :  { %v611_v56 = vsel %vm242_vm3, %v2789_v55, 0.0 }
 0x747   :  { %612 = vadd.xlane.f32.xlu0 %v611_v56 }
 0x75d   :  { %619 = vrot.lane.b32.xlu0 %v3191_v50, %s3024_s24 }
 0x7d0   :  { %v610_v58 = vpop.xlane.xlu0 %609 }
 0x7d1   :  { %2790 = vrcp.f32 %v610_v58 }
 0x7d4   :  { %v613_v59 = vpop.xlane.xlu0 %612 }
 0x7d5   :  { %2792 = vrcp.f32 %v613_v59 }
 0x7d8   :  { %v620_v60 = vpop.permute.xlu0 %619 }
 0x7d9   :  { %2557 = vmatpush3.bf16.msra.mxu0 %v620_v60 }
 0x7da   :  { %2568 = vmatprep.subr.bf16.mxu0 %v3013_v22 }
 0x7db   :  { %v2791_v62 = vpop.eup %2790 }
 0x7dc   :  { %v616_v0 = vmul.f32 %v2791_v62, %v2787_v53  ;;  %v2395_v53 = vcombine.low %v3160_v24, %v3160_v24 }
 0x7df   :  { %v2793_v63 = vpop.eup %2792 }
 0x7e0   :  { %v617_v1 = vmul.f32 %v2793_v63, %v2789_v55 }
 0x7e2   :  { %v618_v3 = vpack.c.bf16 %v617_v1, %v616_v0 }
 0x7e4   :  { %2559 = vmatmul.mubr.msk.bf16.vlgmr.msra.gmra.mrb[16].mxu0 %vm242_vm3, %v618_v3 }
 0x7e5   :  { %2569 = vmatpush3.bf16.xpose.msra.mxu0 %v727_v6  ;;  %2570 = vmatprep.mubr.msk.bf16.mxu0 %vm3014_vm1, %v3013_v22 }
 0x7e6   :  { %2580 = vmatprep.subr.bf16.mxu0 %v3013_v22 }
 0x7ec   :  { %2571 = vmatmul.mubr.msk.bf16.vlgmr.msra.gmra.mrb[20].mxu0 %vm190_vm2, %v720_v9 }
 0x7ed   :  { %2582 = vmatprep.mubr.msk.bf16.mxu0 %vm3014_vm1, %v3013_v22 }
 0x80e   :  { %v534_v10 = vpop.f32.mrb[12].mxu0 }
 0x80f   :  { %v3295_v11 = vadd.f32 %v534_v10, %v3261_v26  ;;  %v2548_v12 = vpop.f32.mrb[13].mxu0 }
 0x810   :  { %v537_v13 = vpop.f32.mrb[14].mxu0 }
 0x811   :  { %v3298_v14 = vadd.f32 %v537_v13, %v3263_v28  ;;  %v2549_v15 = vpop.f32.mrb[15].mxu0 }
 0x8b7   :  { %v659_v16 = vpop.f32.mrb[16].mxu0 }
 0x8b8   :  { %v2560_v17 = vpop.f32.mrb[17].mxu0 }
 0x8b9   :  { %v662_v18 = vpop.f32.mrb[18].mxu0  ;;  %v3334_v17 = vsub.s32 1, %v3134_v5 }
 0x8ba   :  { %v666_v21 = vpack.c.bf16 %v662_v18, %v659_v16  ;;  %v2561_v25 = vpop.f32.mrb[19].mxu0 }
 0x8bf   :  { %v763_v27 = vpop.f32.mrb[20].mxu0 }
 0x8c0   :  { %v770_v29 = vmul.f32 0.35355338, %v763_v27  ;;  %v2572_v30 = vpop.f32.mrb[21].mxu0 }
 0x8c1   :  { %v766_v31 = vpop.f32.mrb[22].mxu0 }
 0x8c2   :  { %v771_v32 = vmul.f32 0.35355338, %v766_v31  ;;  %v2573_v33 = vpop.f32.mrb[23].mxu0  ;;  %v772_v26 = vadd.f32 %v770_v29, %v3213_v57 }
 0x8c4   :  { %v774_v34 = vsel %vm242_vm3, %v772_v26, -inf  ;;  %v773_v35 = vadd.f32 %v771_v32, %v3218_v61 }
 0x8c5   :  { %775 = vmax.xlane.f32.xlu1 %v774_v34 }
 0x8c6   :  { %v777_v28 = vsel %vm242_vm3, %v773_v35, -inf }
 0x8c7   :  { %778 = vmax.xlane.f32.xlu0 %v777_v28 }
 0x8d6   :  { %668 = vrot.lane.b32.xlu1 %v2391_v36, %s3019_s17 }
 0x8da   :  { %846 = vrot.lane.b32.xlu1 %v2395_v53, %s3019_s17 }
 0x952   :  { %v776_v37 = vpop.xlane.xlu1 %775 }
 0x953   :  { %v780_v39 = vsub.f32 %v772_v26, %v776_v37 }
 0x954   :  { %v779_v41 = vpop.xlane.xlu0 %778 }
 0x955   :  { %v782_v43 = vmul.f32 1.442695, %v780_v39  ;;  %v781_v44 = vsub.f32 %v773_v35, %v779_v41 }
 0x956   :  { %v669_v45 = vpop.permute.xlu1 %668 }
 0x957   :  { %2794 = vpow2.f32 %v782_v43  ;;  %v784_v46 = vmul.f32 1.442695, %v781_v44  ;;  %v674_v47 = vsel %vm446_vm4, %v669_v45, 0 }
 0x958   :  { %2563 = vmatpush3.bf16.msra.mxu1 %v674_v47 }
 0x959   :  { %2796 = vpow2.f32 %v784_v46  ;;  %2574 = vmatprep.subr.bf16.mxu1 %v3013_v22 }
 0x95a   :  { %v847_v0 = vpop.permute.xlu1 %846 }
 0x95b   :  { %2565 = vmatmul.mubr.msk.bf16.vlgmr.msra.gmra.mrb[16].mxu1 %vm190_vm2, %v666_v21  ;;  %v852_v1 = vsel %vm446_vm4, %v847_v0, 0 }
 0x95c   :  { %2576 = vmatprep.mubr.msk.bf16.mxu1 %vm3014_vm1, %v3013_v22  ;;  %2581 = vmatpush3.bf16.msra.mxu0 %v852_v1 }
 0x95d   :  { %2594 = vmatprep.subr.bf16.mxu0 %v3013_v22 }
 0x961   :  { %v2795_v48 = vpop.eup %2794 }
 0x962   :  { %v786_v49 = vsel %vm242_vm3, %v2795_v48, 0.0 }
 0x963   :  { %v2797_v51 = vpop.eup %2796  ;;  %787 = vadd.xlane.f32.xlu0 %v786_v49 }
 0x964   :  { %v789_v52 = vsel %vm242_vm3, %v2797_v51, 0.0 }
 0x967   :  { %790 = vadd.xlane.f32.xlu0 %v789_v52 }
 0x97d   :  { %797 = vrot.lane.b32.xlu0 %v3191_v50, %s3025_s25  ;;  %v2397_v50 = vcombine.high %v3149_v19, %v3151_v20 }
 0x9f0   :  { %v788_v54 = vpop.xlane.xlu0 %787 }
 0x9f1   :  { %2798 = vrcp.f32 %v788_v54 }
 0x9f4   :  { %v791_v55 = vpop.xlane.xlu0 %790 }
 0x9f5   :  { %2800 = vrcp.f32 %v791_v55 }
 0x9f8   :  { %v798_v56 = vpop.permute.xlu0 %797 }
 0x9f9   :  { %2575 = vmatpush3.bf16.msra.mxu1 %v798_v56 }
 0x9fa   :  { %2586 = vmatprep.subr.bf16.mxu1 %v3013_v22 }
 0x9fb   :  { %v2799_v58 = vpop.eup %2798 }
 0x9fc   :  { %v794_v60 = vmul.f32 %v2799_v58, %v2795_v48 }
 0x9ff   :  { %v2801_v59 = vpop.eup %2800 }
 0xa00   :  { %v795_v62 = vmul.f32 %v2801_v59, %v2797_v51 }
 0xa02   :  { %v796_v63 = vpack.c.bf16 %v795_v62, %v794_v60 }
 0xa04   :  { %2577 = vmatmul.mubr.msk.bf16.vlgmr.msra.gmra.mrb[20].mxu1 %vm242_vm3, %v796_v63 }
 0xa05   :  { %2587 = vmatpush3.bf16.msra.mxu1 %v2397_v50  ;;  %2590 = vmatprep.mubr.msk.bf16.mxu1 %vm3014_vm1, %v3013_v22 }
 0xa06   :  { %2588 = vmatprep.subr.bf16.mxu1 %v3013_v22 }
 0xa2e   :  { %v710_v2 = vpop.f32.mrb[16].mxu1 }
 0xa2f   :  { %v717_v3 = vadd.f32 %v710_v2, %v3295_v11  ;;  %v2566_v6 = vpop.f32.mrb[17].mxu1  ;;  %v900_v11 = vrot.slane %v3187_v42, %v3334_v17 }
 0xa30   :  { %v713_v19 = vpop.f32.mrb[18].mxu1 }
 0xa31   :  { %v718_v20 = vadd.f32 %v713_v19, %v3298_v14  ;;  %v2567_v9 = vpop.f32.mrb[19].mxu1 }
 0xad7   :  { %v837_v10 = vpop.f32.mrb[20].mxu1 }
 0xad8   :  { %v2578_v12 = vpop.f32.mrb[21].mxu1 }
 0xad9   :  { %v840_v13 = vpop.f32.mrb[22].mxu1 }
 0xada   :  { %v844_v15 = vpack.c.bf16 %v840_v13, %v837_v10  ;;  %v2579_v16 = vpop.f32.mrb[23].mxu1 }
 0xadc   :  { %2583 = vmatmul.mubr.msk.bf16.vlgmr.msra.gmra.mrb[24].mxu0 %vm190_vm2, %v844_v15 }
 0xadd   :  { %2598 = vmatprep.mubr.msk.bf16.mxu0 %vm3014_vm1, %v3013_v22 }
 0xbaf   :  { %v888_v18 = vpop.f32.mrb[24].mxu0 }
 0xbb0   :  { %v895_v21 = vadd.f32 %v888_v18, %v717_v3  ;;  %v2584_v14 = vpop.f32.mrb[25].mxu0  ;;  %v945_v3 = vsub.s32 2, %v3134_v5 }
 0xbb1   :  { %v891_v25 = vpop.f32.mrb[26].mxu0 }
 0xbb2   :  { %v901_v27 = vadd.f32 %v900_v11, %v895_v21  ;;  %v896_v29 = vadd.f32 %v891_v25, %v718_v20  ;;  %v2585_v30 = vpop.f32.mrb[27].mxu0  ;;  %v946_v6 = vrot.slane %v3187_v42, %v945_v3 }
 0xbb4   :  { %v902_v31 = vadd.f32 %v900_v11, %v896_v29  ;;  %v903_v32 = vadd.f32 %v901_v27, %v3170_v38 }
 0xbb6   :  { %v905_v33 = vsel %vm76_vm0, %v903_v32, 0.0  ;;  %v904_v26 = vadd.f32 %v902_v31, %v3175_v40  ;;  %v2398_v40 = vcombine.high %v3158_v23, %v3160_v24 }
 0xbb7   :  { %906 = vadd.xlane.f32.xlu1 %v905_v33 }
 0xbb8   :  { %v908_v34 = vsel %vm76_vm0, %v904_v26, 0.0  ;;  %2589 = vmatpush3.bf16.msra.mxu1 %v2398_v40 }
 0xbb9   :  { %909 = vadd.xlane.f32.xlu0 %v908_v34  ;;  %2602 = vmatprep.subr.bf16.mxu1 %v3013_v22 }
 0xc44   :  { %v907_v35 = vpop.xlane.xlu1 %906 }
 0xc45   :  { %v911_v28 = vmul.f32 0.03125, %v907_v35 }
 0xc46   :  { %v910_v36 = vpop.xlane.xlu0 %909 }
 0xc47   :  { %v913_v37 = vsub.f32 %v903_v32, %v911_v28  ;;  %v912_v39 = vmul.f32 0.03125, %v910_v36 }
 0xc49   :  { %v914_v41 = vsub.f32 %v904_v26, %v912_v39  ;;  %v915_v43 = vmul.f32 %v913_v37, %v913_v37 }
 0xc4b   :  { %v917_v44 = vsel %vm76_vm0, %v915_v43, 0.0  ;;  %v916_v45 = vmul.f32 %v914_v41, %v914_v41 }
 0xc4c   :  { %918 = vadd.xlane.f32.xlu0 %v917_v44 }
 0xc4d   :  { %v920_v38 = vsel %vm76_vm0, %v916_v45, 0.0 }
 0xc4e   :  { %921 = vadd.xlane.f32.xlu1 %v920_v38 }
 0xc5f   :  { %937 = vrot.lane.b32.xlu1 %v900_v11, %s3018_s16 }
 0xc62   :  { %932 = vrot.lane.b32.xlu0 %v900_v11, %s3012_s4 }
 0xc63   :  { %1018 = vrot.lane.b32.xlu1 %v2397_v50, %s3018_s16 }
 0xc66   :  { %1022 = vrot.lane.b32.xlu0 %v900_v11, %s3019_s17 }
 0xc67   :  { %1020 = vrot.lane.b32.xlu1 %v2398_v40, %s3018_s16 }
 0xcd9   :  { %v919_v46 = vpop.xlane.xlu0 %918 }
 0xcda   :  { %v923_v47 = vmul.f32 0.03125, %v919_v46 }
 0xcdb   :  { %v922_v48 = vpop.xlane.xlu1 %921 }
 0xcdc   :  { %v925_v49 = vadd.f32 1e-12, %v923_v47  ;;  %v924_v51 = vmul.f32 0.03125, %v922_v48 }
 0xcdd   :  { %v933_v54 = vpop.permute.xlu0 %932 }
 0xcde   :  { %2802 = vrsqrt.f32 %v925_v49  ;;  %v926_v52 = vadd.f32 1e-12, %v924_v51 }
 0xcdf   :  { %v938_v23 = vpop.permute.xlu1 %937 }
 0xce0   :  { %2804 = vrsqrt.f32 %v926_v52 }
 0xce3   :  { %v1019_v63 = vpop.permute.xlu1 %1018 }
 0xce4   :  { %v1030_v0 = vsel %vm1025_vm5, %v1019_v63, 0  ;;  %v3381_v63 = vld [vmem:[#allocation5 + $0x38] sm:$0xff] }
 0xce5   :  { %2595 = vmatpush3.bf16.xpose.msra.mxu0 %v1030_v0 }
 0xce6   :  { %2596 = vmatprep.subr.bf16.mxu0 %v3013_v22 }
 0xce7   :  { %v1021_v1 = vpop.permute.xlu1 %1020 }
 0xce8   :  { %v2803_v53 = vpop.eup %2802  ;;  %v1033_v2 = vsel %vm1025_vm5, %v1021_v1, 0 }
 0xce9   :  { %v929_v55 = vmul.f32 %v2803_v53, %v913_v37  ;;  %v1023_v37 = vpop.permute.xlu0 %1022 }
 0xcea   :  { %v2805_v56 = vpop.eup %2804 }
 0xceb   :  { %v930_v58 = vmul.f32 %v2805_v56, %v914_v41  ;;  %v935_v59 = vmul.f32 %v933_v54, %v929_v55 }
 0xced   :  { %v936_v24 = vmul.f32 %v933_v54, %v930_v58  ;;  %v940_v60 = vadd.f32 %v938_v23, %v935_v59  ;;  %2597 = vmatpush3.bf16.xpose.msra.mxu0 %v1033_v2 }
 0xcee   :  { %2616 = vmatprep.subr.bf16.mxu0 %v3013_v22 }
 0xcef   :  { %v941_v62 = vadd.f32 %v938_v23, %v936_v24  ;;  %v3372_v24 = vld [vmem:[#allocation5 + $0x20] sm:$0xff] }
 0xcf1   :  { %v942_v50 = vpack.c.bf16 %v941_v62, %v940_v60 }
 0xcf3   :  { %2591 = vmatmul.mubr.msk.bf16.vlgmr.msra.gmra.mrb[24].mxu1 %vm76_vm0, %v942_v50  ;;  %v3379_v50 = vld [vmem:[#allocation5 + $0x30] sm:$0xff] }
 0xcf4   :  { %2606 = vmatprep.mubr.msk.bf16.mxu1 %vm3014_vm1, %v3013_v22  ;;  %v2403_v0 = vcombine.low %v3379_v50, %v3381_v63 }
 0xdc6   :  { %v992_v19 = vpop.f32.mrb[24].mxu1 }
 0xdc7   :  { %v993_v20 = vadd.f32 %v992_v19, %v946_v6  ;;  %v2592_v9 = vpop.f32.mrb[25].mxu1 }
 0xdc8   :  { %v995_v10 = vpop.f32.mrb[26].mxu1 }
 0xdc9   :  { %v1001_v12 = vmul.f32 0.044715, %v993_v20  ;;  %v996_v13 = vadd.f32 %v995_v10, %v946_v6  ;;  %v2593_v15 = vpop.f32.mrb[27].mxu1  ;;  %v999_v33 = vmul.f32 0.5, %v993_v20 }
 0xdcb   :  { %v1003_v16 = vmul.f32 %v1001_v12, %v993_v20  ;;  %v1002_v11 = vmul.f32 0.044715, %v996_v13  ;;  %v1000_v26 = vmul.f32 0.5, %v996_v13 }
 0xdcd   :  { %v1005_v18 = vmul.f32 %v1003_v16, %v993_v20  ;;  %v1004_v21 = vmul.f32 %v1002_v11, %v996_v13 }
 0xdcf   :  { %v1007_v14 = vadd.f32 %v1005_v18, %v993_v20  ;;  %v1006_v25 = vmul.f32 %v1004_v21, %v996_v13 }
 0xdd1   :  { %v1009_v27 = vmul.f32 0.7978846, %v1007_v14  ;;  %v1008_v29 = vadd.f32 %v1006_v25, %v996_v13 }
 0xdd3   :  { %2806 = vtanh.f32 %v1009_v27  ;;  %v1010_v30 = vmul.f32 0.7978846, %v1008_v29  ;;  %v3402_v29 = vld [vmem:[%s3661_s3 + $0x4] sm:$0x7] }
 0xdd5   :  { %2808 = vtanh.f32 %v1010_v30  ;;  %v1129_v30 = vrot.slane %v3402_v29, %v3140_v7 }
 0xddd   :  { %v2807_v31 = vpop.eup %2806 }
 0xdde   :  { %v1013_v42 = vadd.f32 1.0, %v2807_v31 }
 0xddf   :  { %v2809_v32 = vpop.eup %2808 }
 0xde0   :  { %v1014_v34 = vadd.f32 1.0, %v2809_v32  ;;  %v1015_v35 = vmul.f32 %v1013_v42, %v999_v33 }
 0xde2   :  { %v1016_v28 = vmul.f32 %v1014_v34, %v1000_v26 }
 0xde4   :  { %v1017_v36 = vpack.c.bf16 %v1016_v28, %v1015_v35 }
 0xde6   :  { %2599 = vmatmul.mubr.msk.bf16.vlgmr.msra.gmra.mrb[28].mxu0 %vm1025_vm5, %v1017_v36 }
 0xde7   :  { %2618 = vmatprep.mubr.msk.bf16.mxu0 %vm3014_vm1, %v3013_v22 }
 0xeb9   :  { %v1069_v39 = vpop.f32.mrb[28].mxu0 }
 0xeba   :  { %v1070_v41 = vadd.f32 %v1069_v39, %v1023_v37  ;;  %v2600_v43 = vpop.f32.mrb[29].mxu0 }
 0xebb   :  { %v1072_v44 = vpop.f32.mrb[30].mxu0 }
 0xebc   :  { %v1073_v45 = vadd.f32 %v1072_v44, %v1023_v37  ;;  %v2601_v38 = vpop.f32.mrb[31].mxu0  ;;  %v1076_v40 = vadd.f32 %v1070_v41, %v940_v60  ;;  %v3374_v60 = vld [vmem:[#allocation5 + $0x28] sm:$0xff] }
 0xebe   :  { %v1078_v46 = vsel %vm76_vm0, %v1076_v40, 0.0  ;;  %v1077_v47 = vadd.f32 %v1073_v45, %v941_v62  ;;  %v2402_v62 = vcombine.low %v3372_v24, %v3374_v60 }
 0xebf   :  { %1079 = vadd.xlane.f32.xlu1 %v1078_v46 }
 0xec0   :  { %v1081_v48 = vsel %vm76_vm0, %v1077_v47, 0.0  ;;  %2603 = vmatpush3.bf16.msra.mxu1 %v2402_v62 }
 0xec1   :  { %1082 = vadd.xlane.f32.xlu0 %v1081_v48  ;;  %2604 = vmatprep.subr.bf16.mxu1 %v3013_v22 }
 0xec4   :  { %2605 = vmatpush3.bf16.msra.mxu1 %v2403_v0 }
 0xec5   :  { %2610 = vmatprep.subr.bf16.mxu1 %v3013_v22 }
 0xed0   :  { %1105 = vrot.lane.b32.xlu1 %v946_v6, %s3018_s16 }
 0xf4c   :  { %v1080_v49 = vpop.xlane.xlu1 %1079 }
 0xf4d   :  { %v1084_v51 = vmul.f32 0.03125, %v1080_v49 }
 0xf4e   :  { %v1083_v52 = vpop.xlane.xlu0 %1082 }
 0xf4f   :  { %v1086_v53 = vsub.f32 %v1076_v40, %v1084_v51  ;;  %v1085_v54 = vmul.f32 0.03125, %v1083_v52 }
 0xf50   :  { %v1106_v12 = vpop.permute.xlu1 %1105 }
 0xf51   :  { %v1087_v55 = vsub.f32 %v1077_v47, %v1085_v54  ;;  %v1088_v56 = vmul.f32 %v1086_v53, %v1086_v53 }
 0xf53   :  { %v1090_v58 = vsel %vm76_vm0, %v1088_v56, 0.0  ;;  %v1089_v59 = vmul.f32 %v1087_v55, %v1087_v55 }
 0xf54   :  { %1091 = vadd.xlane.f32.xlu0 %v1090_v58 }
 0xf55   :  { %v1093_v23 = vsel %vm76_vm0, %v1089_v59, 0.0 }
 0xf58   :  { %1094 = vadd.xlane.f32.xlu0 %v1093_v23 }
 0xf6e   :  { %1110 = vrot.lane.b32.xlu0 %v946_v6, %s3019_s17 }
 0xfe1   :  { %v1092_v1 = vpop.xlane.xlu0 %1091 }
 0xfe2   :  { %v1096_v2 = vmul.f32 0.03125, %v1092_v1 }
 0xfe4   :  { %v1098_v6 = vadd.f32 1e-12, %v1096_v2 }
 0xfe5   :  { %v1095_v19 = vpop.xlane.xlu0 %1094 }
 0xfe6   :  { %2810 = vrsqrt.f32 %v1098_v6  ;;  %v1097_v20 = vmul.f32 0.03125, %v1095_v19 }
 0xfe8   :  { %v1099_v9 = vadd.f32 1e-12, %v1097_v20 }
 0xfe9   :  { %v1111_v15 = vpop.permute.xlu0 %1110 }
 0xfea   :  { %2812 = vrsqrt.f32 %v1099_v9 }
 0xff0   :  { %v2811_v10 = vpop.eup %2810 }
 0xff1   :  { %v1102_v13 = vmul.f32 %v2811_v10, %v1086_v53 }
 0xff3   :  { %v1108_v16 = vmul.f32 %v1106_v12, %v1102_v13 }
 0xff4   :  { %v2813_v11 = vpop.eup %2812 }
 0xff5   :  { %v1103_v18 = vmul.f32 %v2813_v11, %v1087_v55  ;;  %v3386_v21 = vadd.f32 %v1111_v15, %v1108_v16 }
 0xff7   :  { %v1109_v14 = vmul.f32 %v1106_v12, %v1103_v18  ;;  %1116 = vst.msk [vmem:[#allocation8 + $0x10] sm:$0xff] %vm76_vm0, %v3386_v21 }
 0xff9   :  { %v3390_v25 = vadd.f32 %v1111_v15, %v1109_v14 }
 0xffb   :  { %1117 = vst.msk [vmem:[#allocation8 + $0x18] sm:$0xff] %vm76_vm0, %v3390_v25  ;;  %v1125_v27 = vpack.c.bf16 %v3390_v25, %v3386_v21 }
 0xffd   :  { %2607 = vmatmul.mubr.msk.bf16.vlgmr.msra.gmra.mrb[28].mxu1 %vm76_vm0, %v1125_v27 }
 0xffe   :  { %2612 = vmatprep.mubr.msk.bf16.mxu1 %vm3014_vm1, %v3013_v22 }
0x10d0   :  { %v1179_v31 = vpop.f32.mrb[28].mxu1 }
0x10d1   :  { %v2608_v42 = vpop.f32.mrb[29].mxu1  ;;  %v1180_v33 = vadd.f32 %v1179_v31, %v1129_v30 }
0x10d2   :  { %v1182_v32 = vpop.f32.mrb[30].mxu1  ;;  %v2409_v42 = vcombine.low %v3374_v60, %v3374_v60 }
0x10d3   :  { %v1183_v26 = vadd.f32 %v1182_v32, %v1129_v30  ;;  %v2609_v34 = vpop.f32.mrb[31].mxu1 }
0x10d5   :  { %v3406_v35 = vpack.c.bf16 %v1183_v26, %v1180_v33 }
0x10d7   :  { %1188 = vrot.lane.b32.xlu1 %v3406_v35, %s3012_s4 }
0x10db   :  { %1314 = vrot.lane.b32.xlu1 %v3406_v35, %s3015_s30 }
0x10df   :  { %1312 = vrot.lane.b32.xlu1 %v3406_v35, %s3016_s11  ;;  %s3027_s11 = smov [#allocation8]  }
0x10e0   :  { %s2338_s13 = sshll.u32 %s3027_s11, 4  ;;  %s3612_s13 = int_to_ptr.vmem [resolvable:$true] %s2338_s13 }
0x1149   :  { %v1189_v28 = vpop.permute.xlu1 %1188 }
0x114a   :  { %v1194_v7 = vsel %vm190_vm2, %v1189_v28, 0 }
0x114b   :  { %2611 = vmatpush3.bf16.xpose.msra.mxu1 %v1194_v7 }
0x114c   :  { %2622 = vmatprep.subr.bf16.mxu1 %v3013_v22 }
0x114d   :  { %v1315_v36 = vpop.permute.xlu1 %1314 }
0x114e   :  { %v1320_v37 = vsel %vm190_vm2, %v1315_v36, 0 }
0x1151   :  { %v1313_v39 = vpop.permute.xlu1 %1312 }
0x1152   :  { %2613 = vmatmul.mubr.msk.bf16.vlgmr.msra.gmra.mrb[32].mxu1 %vm190_vm2, %v3406_v35 }
0x1153   :  { %2623 = vmatpush3.bf16.xpose.msra.mxu1 %v1320_v37  ;;  %2624 = vmatprep.mubr.msk.bf16.mxu1 %vm3014_vm1, %v3013_v22 }
0x1154   :  { %2634 = vmatprep.subr.bf16.mxu1 %v3013_v22 }
0x115a   :  { %2625 = vmatmul.mubr.msk.bf16.vlgmr.msra.gmra.mrb[36].mxu1 %vm190_vm2, %v1313_v39 }
0x115b   :  { %2636 = vmatprep.mubr.msk.bf16.mxu1 %vm3014_vm1, %v3013_v22 }
0x1225   :  { %v1230_v41 = vpop.f32.mrb[32].mxu1 }
0x1226   :  { %v1237_v43 = vmul.f32 0.35355338, %v1230_v41  ;;  %v2614_v44 = vpop.f32.mrb[33].mxu1 }
0x1227   :  { %v1233_v45 = vpop.f32.mrb[34].mxu1 }
0x1228   :  { %v1238_v38 = vmul.f32 0.35355338, %v1233_v45  ;;  %v2615_v40 = vpop.f32.mrb[35].mxu1  ;;  %v1239_v46 = vadd.f32 %v1237_v43, %v3213_v57 }
0x122a   :  { %v1241_v47 = vsel %vm242_vm3, %v1239_v46, -inf  ;;  %v1240_v48 = vadd.f32 %v1238_v38, %v3218_v61 }
0x122b   :  { %1242 = vmax.xlane.f32.xlu0 %v1241_v47 }
0x122c   :  { %v1244_v49 = vsel %vm242_vm3, %v1240_v48, -inf }
0x122d   :  { %1245 = vmax.xlane.f32.xlu1 %v1244_v49  ;;  %v1356_v51 = vpop.f32.mrb[36].mxu1 }
0x122e   :  { %v1363_v52 = vmul.f32 0.35355338, %v1356_v51  ;;  %v2626_v53 = vpop.f32.mrb[37].mxu1 }
0x122f   :  { %v1359_v54 = vpop.f32.mrb[38].mxu1 }
0x1230   :  { %v1364_v55 = vmul.f32 0.35355338, %v1359_v54  ;;  %v2627_v56 = vpop.f32.mrb[39].mxu1  ;;  %v1365_v58 = vadd.f32 %v1363_v52, %v3213_v57 }
0x1232   :  { %v1367_v59 = vsel %vm242_vm3, %v1365_v58, -inf  ;;  %v1366_v23 = vadd.f32 %v1364_v55, %v3218_v61 }
0x1233   :  { %1368 = vmax.xlane.f32.xlu0 %v1367_v59 }
0x1234   :  { %v1370_v62 = vsel %vm242_vm3, %v1366_v23, -inf }
0x1237   :  { %1371 = vmax.xlane.f32.xlu0 %v1370_v62 }
0x12b8   :  { %v1243_v0 = vpop.xlane.xlu0 %1242 }
0x12b9   :  { %v1247_v1 = vsub.f32 %v1239_v46, %v1243_v0 }
0x12ba   :  { %v1246_v2 = vpop.xlane.xlu1 %1245 }
0x12bb   :  { %v1249_v6 = vmul.f32 1.442695, %v1247_v1  ;;  %v1248_v19 = vsub.f32 %v1240_v48, %v1246_v2 }
0x12bd   :  { %2814 = vpow2.f32 %v1249_v6  ;;  %v1251_v20 = vmul.f32 1.442695, %v1248_v19 }
0x12bf   :  { %2816 = vpow2.f32 %v1251_v20 }
0x12c0   :  { %v1369_v9 = vpop.xlane.xlu0 %1368 }
0x12c1   :  { %v1373_v10 = vsub.f32 %v1365_v58, %v1369_v9 }
0x12c3   :  { %v1375_v12 = vmul.f32 1.442695, %v1373_v10 }
0x12c4   :  { %v1372_v57 = vpop.xlane.xlu0 %1371 }
0x12c5   :  { %2818 = vpow2.f32 %v1375_v12  ;;  %v1374_v13 = vsub.f32 %v1366_v23, %v1372_v57 }
0x12c7   :  { %v2815_v15 = vpop.eup %2814  ;;  %v1377_v61 = vmul.f32 1.442695, %v1374_v13 }
0x12c8   :  { %v1253_v16 = vsel %vm242_vm3, %v2815_v15, 0.0 }
0x12c9   :  { %v2817_v11 = vpop.eup %2816  ;;  %2820 = vpow2.f32 %v1377_v61  ;;  %1254 = vadd.xlane.f32.xlu0 %v1253_v16  ;;  %v3473_v61 = vld [vmem:[%s3659_s1] sm:$0xff] }
0x12ca   :  { %v1256_v18 = vsel %vm242_vm3, %v2817_v11, 0.0 }
0x12cb   :  { %1257 = vadd.xlane.f32.xlu1 %v1256_v18  ;;  %v3480_v18 = vld [vmem:[%s3659_s1 + $0x8] sm:$0xff] }
0x12cf   :  { %v2819_v14 = vpop.eup %2818 }
0x12d0   :  { %v1379_v27 = vsel %vm242_vm3, %v2819_v14, 0.0 }
0x12d1   :  { %1380 = vadd.xlane.f32.xlu0 %v1379_v27 }
0x12d3   :  { %v2821_v30 = vpop.eup %2820 }
0x12d4   :  { %v1382_v31 = vsel %vm242_vm3, %v2821_v30, 0.0 }
0x12d5   :  { %1383 = vadd.xlane.f32.xlu1 %v1382_v31 }
0x12e6   :  { %1390 = vrot.lane.b32.xlu1 %v3406_v35, %s3017_s15 }
0x12e7   :  { %1264 = vrot.lane.b32.xlu0 %v3406_v35, %s3018_s16 }
0x12ea   :  { %1439 = vrot.lane.b32.xlu1 %v2409_v42, %s3019_s17 }
0x12eb   :  { %1538 = vrot.lane.b32.xlu0 %v3406_v35, %s3020_s18 }
0x12ee   :  { %1540 = vrot.lane.b32.xlu1 %v3406_v35, %s3021_s19 }
0x1356   :  { %v1255_v32 = vpop.xlane.xlu0 %1254 }
0x1357   :  { %2822 = vrcp.f32 %v1255_v32 }
0x1358   :  { %v1258_v33 = vpop.xlane.xlu1 %1257 }
0x1359   :  { %2824 = vrcp.f32 %v1258_v33 }
0x135e   :  { %v1381_v26 = vpop.xlane.xlu0 %1380 }
0x135f   :  { %2826 = vrcp.f32 %v1381_v26 }
0x1361   :  { %v2823_v34 = vpop.eup %2822 }
0x1362   :  { %v1384_v28 = vpop.xlane.xlu1 %1383  ;;  %v1265_v7 = vpop.permute.xlu0 %1264  ;;  %v1261_v37 = vmul.f32 %v2823_v34, %v2815_v15 }
0x1363   :  { %v2825_v36 = vpop.eup %2824  ;;  %2828 = vrcp.f32 %v1384_v28  ;;  %2617 = vmatpush3.bf16.msra.mxu0 %v1265_v7 }
0x1364   :  { %v1262_v39 = vmul.f32 %v2825_v36, %v2817_v11  ;;  %2628 = vmatprep.subr.bf16.mxu0 %v3013_v22 }
0x1366   :  { %v1391_v41 = vpop.permute.xlu1 %1390  ;;  %v1263_v43 = vpack.c.bf16 %v1262_v39, %v1261_v37  ;;  %v1539_v1 = vpop.permute.xlu0 %1538 }
0x1368   :  { %2619 = vmatmul.mubr.msk.bf16.vlgmr.msra.gmra.mrb[32].mxu0 %vm242_vm3, %v1263_v43 }
0x1369   :  { %2629 = vmatpush3.bf16.msra.mxu0 %v1391_v41  ;;  %2630 = vmatprep.mubr.msk.bf16.mxu0 %vm3014_vm1, %v3013_v22  ;;  %v2827_v45 = vpop.eup %2826 }
0x136a   :  { %v1440_v44 = vpop.permute.xlu1 %1439  ;;  %2640 = vmatprep.subr.bf16.mxu0 %v3013_v22  ;;  %v1387_v46 = vmul.f32 %v2827_v45, %v2819_v14 }
0x136b   :  { %v1445_v38 = vsel %vm446_vm4, %v1440_v44, 0 }
0x136c   :  { %2635 = vmatpush3.bf16.msra.mxu1 %v1445_v38 }
0x136d   :  { %v2829_v40 = vpop.eup %2828  ;;  %2646 = vmatprep.subr.bf16.mxu1 %v3013_v22 }
0x136e   :  { %v1388_v47 = vmul.f32 %v2829_v40, %v2821_v30  ;;  %v1541_v58 = vpop.permute.xlu1 %1540  ;;  %v2411_v30 = vcombine.low %v3372_v24, %v3372_v24 }
0x136f   :  { %v1546_v0 = vsel %vm190_vm2, %v1541_v58, 0 }
0x1370   :  { %v1389_v48 = vpack.c.bf16 %v1388_v47, %v1387_v46 }
0x1372   :  { %2631 = vmatmul.mubr.msk.bf16.vlgmr.msra.gmra.mrb[36].mxu0 %vm242_vm3, %v1389_v48 }
0x1373   :  { %2642 = vmatprep.mubr.msk.bf16.mxu0 %vm3014_vm1, %v3013_v22 }
0x143b   :  { %v1304_v49 = vpop.f32.mrb[32].mxu0 }
0x143c   :  { %v2620_v51 = vpop.f32.mrb[33].mxu0 }
0x143d   :  { %v1307_v52 = vpop.f32.mrb[34].mxu0 }
0x143e   :  { %v1311_v53 = vpack.c.bf16 %v1307_v52, %v1304_v49  ;;  %v2621_v54 = vpop.f32.mrb[35].mxu0 }
0x1445   :  { %v1430_v55 = vpop.f32.mrb[36].mxu0 }
0x1446   :  { %v2632_v56 = vpop.f32.mrb[37].mxu0 }
0x1447   :  { %v1433_v59 = vpop.f32.mrb[38].mxu0 }
0x1448   :  { %v1437_v23 = vpack.c.bf16 %v1433_v59, %v1430_v55  ;;  %v2633_v62 = vpop.f32.mrb[39].mxu0 }
0x144a   :  { %2637 = vmatmul.mubr.msk.bf16.vlgmr.msra.gmra.mrb[40].mxu1 %vm190_vm2, %v1437_v23 }
0x144b   :  { %2647 = vmatpush3.bf16.xpose.msra.mxu1 %v1546_v0  ;;  %2648 = vmatprep.mubr.msk.bf16.mxu1 %vm3014_vm1, %v3013_v22 }
0x144c   :  { %2658 = vmatprep.subr.bf16.mxu1 %v3013_v22 }
0x1452   :  { %2649 = vmatmul.mubr.msk.bf16.vlgmr.msra.gmra.mrb[44].mxu1 %vm190_vm2, %v1539_v1 }
0x1453   :  { %2660 = vmatprep.mubr.msk.bf16.mxu1 %vm3014_vm1, %v3013_v22 }
0x151d   :  { %v3466_v2 = vpop.f32.mrb[40].mxu1 }
0x151e   :  { %v2638_v6 = vpop.f32.mrb[41].mxu1 }
0x151f   :  { %v3468_v19 = vpop.f32.mrb[42].mxu1 }
0x1520   :  { %v2639_v20 = vpop.f32.mrb[43].mxu1 }
0x1525   :  { %v1582_v9 = vpop.f32.mrb[44].mxu1 }
0x1526   :  { %v1589_v10 = vmul.f32 0.35355338, %v1582_v9  ;;  %v2650_v12 = vpop.f32.mrb[45].mxu1 }
0x1527   :  { %v1585_v57 = vpop.f32.mrb[46].mxu1 }
0x1528   :  { %v1590_v13 = vmul.f32 0.35355338, %v1585_v57  ;;  %v2651_v15 = vpop.f32.mrb[47].mxu1  ;;  %v1591_v16 = vadd.f32 %v3473_v61, %v1589_v10 }
0x152a   :  { %v1593_v11 = vsel %vm242_vm3, %v1591_v16, -inf  ;;  %v1592_v14 = vadd.f32 %v3480_v18, %v1590_v13 }
0x152b   :  { %1594 = vmax.xlane.f32.xlu1 %v1593_v11  ;;  %v2415_v11 = vcombine.low %v3379_v50, %v3379_v50 }
0x152c   :  { %v1596_v27 = vsel %vm242_vm3, %v1592_v14, -inf }
0x152d   :  { %1597 = vmax.xlane.f32.xlu0 %v1596_v27 }
0x153c   :  { %1489 = vrot.lane.b32.xlu1 %v2411_v30, %s3019_s17 }
0x1540   :  { %1718 = vrot.lane.b32.xlu1 %v3406_v35, %s3022_s20 }
0x1544   :  { %1716 = vrot.lane.b32.xlu1 %v3406_v35, %s3023_s23 }
0x15b8   :  { %v1595_v31 = vpop.xlane.xlu1 %1594 }
0x15b9   :  { %v1599_v42 = vsub.f32 %v1591_v16, %v1595_v31 }
0x15ba   :  { %v1598_v32 = vpop.xlane.xlu0 %1597 }
0x15bb   :  { %v1601_v33 = vmul.f32 1.442695, %v1599_v42  ;;  %v1600_v26 = vsub.f32 %v1592_v14, %v1598_v32 }
0x15bc   :  { %v1490_v34 = vpop.permute.xlu1 %1489 }
0x15bd   :  { %2830 = vpow2.f32 %v1601_v33  ;;  %v1603_v28 = vmul.f32 1.442695, %v1600_v26  ;;  %v1495_v7 = vsel %vm446_vm4, %v1490_v34, 0 }
0x15be   :  { %2641 = vmatpush3.bf16.msra.mxu0 %v1495_v7  ;;  %v2419_v7 = vcombine.low %v3381_v63, %v3381_v63 }
0x15bf   :  { %2832 = vpow2.f32 %v1603_v28  ;;  %2652 = vmatprep.subr.bf16.mxu0 %v3013_v22 }
0x15c0   :  { %v1719_v48 = vpop.permute.xlu1 %1718 }
0x15c1   :  { %2643 = vmatmul.mubr.msk.bf16.vlgmr.msra.gmra.mrb[40].mxu0 %vm190_vm2, %v1311_v53  ;;  %v1724_v51 = vsel %vm190_vm2, %v1719_v48, 0 }
0x15c2   :  { %2654 = vmatprep.mubr.msk.bf16.mxu0 %vm3014_vm1, %v3013_v22 }
0x15c4   :  { %v1717_v52 = vpop.permute.xlu1 %1716 }
0x15c7   :  { %v2831_v36 = vpop.eup %2830 }
0x15c8   :  { %v1605_v37 = vsel %vm242_vm3, %v2831_v36, 0.0 }
0x15c9   :  { %v2833_v39 = vpop.eup %2832  ;;  %1606 = vadd.xlane.f32.xlu0 %v1605_v37 }
0x15ca   :  { %v1608_v41 = vsel %vm242_vm3, %v2833_v39, 0.0 }
0x15cd   :  { %1609 = vadd.xlane.f32.xlu0 %v1608_v41 }
0x15e3   :  { %1616 = vrot.lane.b32.xlu0 %v3406_v35, %s3024_s24 }
0x1656   :  { %v1607_v43 = vpop.xlane.xlu0 %1606 }
0x1657   :  { %2834 = vrcp.f32 %v1607_v43 }
0x165a   :  { %v1610_v44 = vpop.xlane.xlu0 %1609 }
0x165b   :  { %2836 = vrcp.f32 %v1610_v44 }
0x165e   :  { %v1617_v45 = vpop.permute.xlu0 %1616 }
0x165f   :  { %2653 = vmatpush3.bf16.msra.mxu0 %v1617_v45 }
0x1660   :  { %2664 = vmatprep.subr.bf16.mxu0 %v3013_v22 }
0x1661   :  { %v2835_v38 = vpop.eup %2834 }
0x1662   :  { %v1613_v46 = vmul.f32 %v2835_v38, %v2831_v36 }
0x1665   :  { %v2837_v40 = vpop.eup %2836 }
0x1666   :  { %v1614_v47 = vmul.f32 %v2837_v40, %v2833_v39 }
0x1668   :  { %v1615_v49 = vpack.c.bf16 %v1614_v47, %v1613_v46 }
0x166a   :  { %2655 = vmatmul.mubr.msk.bf16.vlgmr.msra.gmra.mrb[44].mxu0 %vm242_vm3, %v1615_v49 }
0x166b   :  { %2665 = vmatpush3.bf16.xpose.msra.mxu0 %v1724_v51  ;;  %2666 = vmatprep.mubr.msk.bf16.mxu0 %vm3014_vm1, %v3013_v22 }
0x166c   :  { %2676 = vmatprep.subr.bf16.mxu0 %v3013_v22 }
0x1672   :  { %2667 = vmatmul.mubr.msk.bf16.vlgmr.msra.gmra.mrb[48].mxu0 %vm190_vm2, %v1717_v52 }
0x1673   :  { %2678 = vmatprep.mubr.msk.bf16.mxu0 %vm3014_vm1, %v3013_v22 }
0x1694   :  { %v1531_v53 = vpop.f32.mrb[40].mxu0 }
0x1695   :  { %v3510_v54 = vadd.f32 %v1531_v53, %v3466_v2  ;;  %v2644_v55 = vpop.f32.mrb[41].mxu0 }
0x1696   :  { %v1534_v56 = vpop.f32.mrb[42].mxu0 }
0x1697   :  { %v3513_v58 = vadd.f32 %v1534_v56, %v3468_v19  ;;  %v2645_v59 = vpop.f32.mrb[43].mxu0 }
0x173d   :  { %v1656_v23 = vpop.f32.mrb[44].mxu0 }
0x173e   :  { %v2656_v62 = vpop.f32.mrb[45].mxu0 }
0x173f   :  { %v1659_v0 = vpop.f32.mrb[46].mxu0  ;;  %v1897_v62 = vrot.slane %v3402_v29, %v3334_v17 }
0x1740   :  { %v1663_v1 = vpack.c.bf16 %v1659_v0, %v1656_v23  ;;  %v2657_v6 = vpop.f32.mrb[47].mxu0 }
0x1745   :  { %v1760_v20 = vpop.f32.mrb[48].mxu0 }
0x1746   :  { %v1767_v9 = vmul.f32 0.35355338, %v1760_v20  ;;  %v2668_v10 = vpop.f32.mrb[49].mxu0 }
0x1747   :  { %v1763_v12 = vpop.f32.mrb[50].mxu0 }
0x1748   :  { %v1768_v57 = vmul.f32 0.35355338, %v1763_v12  ;;  %v2669_v13 = vpop.f32.mrb[51].mxu0  ;;  %v1769_v2 = vadd.f32 %v3473_v61, %v1767_v9 }
0x174a   :  { %v1771_v15 = vsel %vm242_vm3, %v1769_v2, -inf  ;;  %v1770_v16 = vadd.f32 %v3480_v18, %v1768_v57 }
0x174b   :  { %1772 = vmax.xlane.f32.xlu1 %v1771_v15 }
0x174c   :  { %v1774_v19 = vsel %vm242_vm3, %v1770_v16, -inf }
0x174d   :  { %1775 = vmax.xlane.f32.xlu0 %v1774_v19 }
0x175c   :  { %1665 = vrot.lane.b32.xlu1 %v2415_v11, %s3019_s17 }
0x1760   :  { %1843 = vrot.lane.b32.xlu1 %v2419_v7, %s3019_s17 }
0x17d8   :  { %v1773_v14 = vpop.xlane.xlu1 %1772 }
0x17d9   :  { %v1777_v27 = vsub.f32 %v1769_v2, %v1773_v14 }
0x17da   :  { %v1776_v30 = vpop.xlane.xlu0 %1775 }
0x17db   :  { %v1779_v31 = vmul.f32 1.442695, %v1777_v27  ;;  %v1778_v42 = vsub.f32 %v1770_v16, %v1776_v30 }
0x17dc   :  { %v1666_v32 = vpop.permute.xlu1 %1665 }
0x17dd   :  { %2838 = vpow2.f32 %v1779_v31  ;;  %v1781_v61 = vmul.f32 1.442695, %v1778_v42  ;;  %v1671_v33 = vsel %vm446_vm4, %v1666_v32, 0  ;;  %v2422_v32 = vcombine.high %v3379_v50, %v3381_v63 }
0x17de   :  { %2659 = vmatpush3.bf16.msra.mxu1 %v1671_v33 }
0x17df   :  { %2840 = vpow2.f32 %v1781_v61  ;;  %2670 = vmatprep.subr.bf16.mxu1 %v3013_v22 }
0x17e1   :  { %2661 = vmatmul.mubr.msk.bf16.vlgmr.msra.gmra.mrb[48].mxu1 %vm190_vm2, %v1663_v1 }
0x17e2   :  { %2672 = vmatprep.mubr.msk.bf16.mxu1 %vm3014_vm1, %v3013_v22 }
0x17e7   :  { %v2839_v18 = vpop.eup %2838 }
0x17e8   :  { %v1783_v26 = vsel %vm242_vm3, %v2839_v18, 0.0 }
0x17e9   :  { %v2841_v34 = vpop.eup %2840  ;;  %1784 = vadd.xlane.f32.xlu0 %v1783_v26 }
0x17ea   :  { %v1786_v28 = vsel %vm242_vm3, %v2841_v34, 0.0 }
0x17ed   :  { %1787 = vadd.xlane.f32.xlu0 %v1786_v28 }
0x1803   :  { %1794 = vrot.lane.b32.xlu0 %v3406_v35, %s3025_s25  ;;  %v1844_v35 = vpop.permute.xlu1 %1843 }
0x1804   :  { %v1849_v40 = vsel %vm446_vm4, %v1844_v35, 0 }
0x1805   :  { %2677 = vmatpush3.bf16.msra.mxu0 %v1849_v40 }
0x1806   :  { %2690 = vmatprep.subr.bf16.mxu0 %v3013_v22 }
0x1876   :  { %v1785_v36 = vpop.xlane.xlu0 %1784 }
0x1877   :  { %2842 = vrcp.f32 %v1785_v36 }
0x187a   :  { %v1788_v37 = vpop.xlane.xlu0 %1787 }
0x187b   :  { %2844 = vrcp.f32 %v1788_v37 }
0x187e   :  { %v1795_v39 = vpop.permute.xlu0 %1794 }
0x187f   :  { %2671 = vmatpush3.bf16.msra.mxu1 %v1795_v39 }
0x1880   :  { %2682 = vmatprep.subr.bf16.mxu1 %v3013_v22 }
0x1881   :  { %v2843_v41 = vpop.eup %2842 }
0x1882   :  { %v1791_v44 = vmul.f32 %v2843_v41, %v2839_v18 }
0x1885   :  { %v2845_v43 = vpop.eup %2844 }
0x1886   :  { %v1792_v45 = vmul.f32 %v2845_v43, %v2841_v34 }
0x1888   :  { %v1793_v38 = vpack.c.bf16 %v1792_v45, %v1791_v44 }
0x188a   :  { %2673 = vmatmul.mubr.msk.bf16.vlgmr.msra.gmra.mrb[52].mxu1 %vm242_vm3, %v1793_v38 }
0x188b   :  { %2686 = vmatprep.mubr.msk.bf16.mxu1 %vm3014_vm1, %v3013_v22 }
0x18b4   :  { %v1707_v46 = vpop.f32.mrb[48].mxu1 }
0x18b5   :  { %v1714_v47 = vadd.f32 %v1707_v46, %v3510_v54  ;;  %v2662_v48 = vpop.f32.mrb[49].mxu1  ;;  %v1943_v46 = vrot.slane %v3402_v29, %v945_v3 }
0x18b6   :  { %v1710_v49 = vpop.f32.mrb[50].mxu1 }
0x18b7   :  { %v1715_v51 = vadd.f32 %v1710_v49, %v3513_v58  ;;  %v2663_v52 = vpop.f32.mrb[51].mxu1 }
0x195d   :  { %v1834_v53 = vpop.f32.mrb[52].mxu1 }
0x195e   :  { %v2674_v55 = vpop.f32.mrb[53].mxu1 }
0x195f   :  { %v1837_v56 = vpop.f32.mrb[54].mxu1 }
0x1960   :  { %v1841_v59 = vpack.c.bf16 %v1837_v56, %v1834_v53  ;;  %v2675_v23 = vpop.f32.mrb[55].mxu1 }
0x1962   :  { %2679 = vmatmul.mubr.msk.bf16.vlgmr.msra.gmra.mrb[52].mxu0 %vm190_vm2, %v1841_v59 }
0x1963   :  { %2694 = vmatprep.mubr.msk.bf16.mxu0 %vm3014_vm1, %v3013_v22 }
0x1a35   :  { %v1885_v0 = vpop.f32.mrb[52].mxu0 }
0x1a36   :  { %v1892_v54 = vadd.f32 %v1885_v0, %v1714_v47  ;;  %v2680_v1 = vpop.f32.mrb[53].mxu0 }
0x1a37   :  { %v1888_v6 = vpop.f32.mrb[54].mxu0 }
0x1a38   :  { %v1898_v20 = vadd.f32 %v1897_v62, %v1892_v54  ;;  %v1893_v58 = vadd.f32 %v1888_v6, %v1715_v51  ;;  %v2681_v9 = vpop.f32.mrb[55].mxu0 }
0x1a3a   :  { %v1899_v10 = vadd.f32 %v1897_v62, %v1893_v58  ;;  %v1900_v12 = vadd.f32 %v1898_v20, %v3386_v21 }
0x1a3c   :  { %v1902_v57 = vsel %vm76_vm0, %v1900_v12, 0.0  ;;  %v1901_v13 = vadd.f32 %v1899_v10, %v3390_v25  ;;  %v2421_v25 = vcombine.high %v3372_v24, %v3374_v60 }
0x1a3d   :  { %1903 = vadd.xlane.f32.xlu1 %v1902_v57 }
0x1a3e   :  { %v1905_v2 = vsel %vm76_vm0, %v1901_v13, 0.0  ;;  %2683 = vmatpush3.bf16.msra.mxu1 %v2421_v25 }
0x1a3f   :  { %1906 = vadd.xlane.f32.xlu0 %v1905_v2  ;;  %2684 = vmatprep.subr.bf16.mxu1 %v3013_v22 }
0x1a42   :  { %2685 = vmatpush3.bf16.msra.mxu1 %v2422_v32 }
0x1a43   :  { %2698 = vmatprep.subr.bf16.mxu1 %v3013_v22 }
0x1aca   :  { %v1904_v15 = vpop.xlane.xlu1 %1903 }
0x1acb   :  { %v1908_v16 = vmul.f32 0.03125, %v1904_v15 }
0x1acc   :  { %v1907_v19 = vpop.xlane.xlu0 %1906 }
0x1acd   :  { %v1910_v11 = vsub.f32 %v1900_v12, %v1908_v16  ;;  %v1909_v14 = vmul.f32 0.03125, %v1907_v19 }
0x1acf   :  { %v1911_v27 = vsub.f32 %v1901_v13, %v1909_v14  ;;  %v1912_v30 = vmul.f32 %v1910_v11, %v1910_v11 }
0x1ad1   :  { %v1914_v31 = vsel %vm76_vm0, %v1912_v30, 0.0  ;;  %v1913_v42 = vmul.f32 %v1911_v27, %v1911_v27 }
0x1ad2   :  { %1915 = vadd.xlane.f32.xlu0 %v1914_v31 }
0x1ad3   :  { %v1917_v21 = vsel %vm76_vm0, %v1913_v42, 0.0 }
0x1ad4   :  { %1918 = vadd.xlane.f32.xlu1 %v1917_v21 }
0x1ae5   :  { %1934 = vrot.lane.b32.xlu1 %v1897_v62, %s3018_s16 }
0x1ae8   :  { %1929 = vrot.lane.b32.xlu0 %v1897_v62, %s3012_s4 }
0x1ae9   :  { %2015 = vrot.lane.b32.xlu1 %v2421_v25, %s3018_s16 }
0x1aec   :  { %2019 = vrot.lane.b32.xlu0 %v1897_v62, %s3019_s17 }
0x1aed   :  { %2017 = vrot.lane.b32.xlu1 %v2422_v32, %s3018_s16 }
0x1b5f   :  { %v1916_v61 = vpop.xlane.xlu0 %1915 }
0x1b60   :  { %v1920_v33 = vmul.f32 0.03125, %v1916_v61 }
0x1b61   :  { %v1919_v18 = vpop.xlane.xlu1 %1918 }
0x1b62   :  { %v1922_v26 = vadd.f32 1e-12, %v1920_v33  ;;  %v1921_v34 = vmul.f32 0.03125, %v1919_v18 }
0x1b63   :  { %v1930_v28 = vpop.permute.xlu0 %1929 }
0x1b64   :  { %2846 = vrsqrt.f32 %v1922_v26  ;;  %v1923_v24 = vadd.f32 1e-12, %v1921_v34 }
0x1b65   :  { %v1935_v50 = vpop.permute.xlu1 %1934 }
0x1b66   :  { %2848 = vrsqrt.f32 %v1923_v24 }
0x1b67   :  { %v2020_v15 = vpop.permute.xlu0 %2019 }
0x1b69   :  { %v2016_v45 = vpop.permute.xlu1 %2015 }
0x1b6a   :  { %v2026_v38 = vsel %vm1025_vm5, %v2016_v45, 0 }
0x1b6b   :  { %2691 = vmatpush3.bf16.xpose.msra.mxu0 %v2026_v38 }
0x1b6c   :  { %2692 = vmatprep.subr.bf16.mxu0 %v3013_v22 }
0x1b6d   :  { %v2018_v35 = vpop.permute.xlu1 %2017 }
0x1b6e   :  { %v2847_v60 = vpop.eup %2846  ;;  %v2029_v40 = vsel %vm1025_vm5, %v2018_v35, 0  ;;  %v2121_v35 = vand.u32 127, %v104_v4  ;;  %v2762_v4 = vld [vmem:[#allocation7 + $0x10] ss:$8 sps:$4 sm:$0xff]  }
0x1b6f   :  { %v1926_v7 = vmul.f32 %v2847_v60, %v1910_v11 }
0x1b70   :  { %v2849_v36 = vpop.eup %2848 }
0x1b71   :  { %v1927_v37 = vmul.f32 %v2849_v36, %v1911_v27  ;;  %v1932_v39 = vmul.f32 %v1930_v28, %v1926_v7  ;;  %v2760_v36 = vld [vmem:[#allocation7] ss:$8 sps:$4 sm:$0xff]  }
0x1b73   :  { %v1933_v63 = vmul.f32 %v1930_v28, %v1927_v37  ;;  %v1937_v41 = vadd.f32 %v1935_v50, %v1932_v39  ;;  %2693 = vmatpush3.bf16.xpose.msra.mxu0 %v2029_v40  ;;  %v2122_v40 = vmul.u32 8, %v3134_v5  ;;  %v2764_v5 = vld [vmem:[#allocation7 + $0x4] ss:$8 sps:$4 sm:$0xff]  }
0x1b74   :  { %2712 = vmatprep.subr.bf16.mxu0 %v3013_v22 }
0x1b75   :  { %v1938_v43 = vadd.f32 %v1935_v50, %v1933_v63  ;;  %vm2123_vm6 = vcmp.eq.s32.totalorder %v2121_v35, %v2122_v40 }
0x1b77   :  { %v1939_v44 = vpack.c.bf16 %v1938_v43, %v1937_v41 }
0x1b79   :  { %2687 = vmatmul.mubr.msk.bf16.vlgmr.msra.gmra.mrb[56].mxu1 %vm76_vm0, %v1939_v44 }
0x1b7a   :  { %2700 = vmatprep.mubr.msk.bf16.mxu1 %vm3014_vm1, %v3013_v22 }
0x1c4c   :  { %v1989_v47 = vpop.f32.mrb[56].mxu1 }
0x1c4d   :  { %v1990_v48 = vadd.f32 %v1989_v47, %v1943_v46  ;;  %v2688_v49 = vpop.f32.mrb[57].mxu1 }
0x1c4e   :  { %v1992_v51 = vpop.f32.mrb[58].mxu1 }
0x1c4f   :  { %v1998_v52 = vmul.f32 0.044715, %v1990_v48  ;;  %v1993_v53 = vadd.f32 %v1992_v51, %v1943_v46  ;;  %v2689_v55 = vpop.f32.mrb[59].mxu1  ;;  %v1996_v9 = vmul.f32 0.5, %v1990_v48 }
0x1c51   :  { %v2000_v56 = vmul.f32 %v1998_v52, %v1990_v48  ;;  %v1999_v59 = vmul.f32 0.044715, %v1993_v53  ;;  %v1997_v10 = vmul.f32 0.5, %v1993_v53 }
0x1c53   :  { %v2002_v23 = vmul.f32 %v2000_v56, %v1990_v48  ;;  %v2001_v62 = vmul.f32 %v1999_v59, %v1993_v53  ;;  %v2765_v59 = vld [vmem:[#allocation7 + $0x14] ss:$8 sps:$4 sm:$0xff]  }
0x1c55   :  { %v2004_v0 = vadd.f32 %v2002_v23, %v1990_v48  ;;  %v2003_v54 = vmul.f32 %v2001_v62, %v1993_v53 }
0x1c57   :  { %v2006_v1 = vmul.f32 0.7978846, %v2004_v0  ;;  %v2005_v6 = vadd.f32 %v2003_v54, %v1993_v53  ;;  %v2124_v53 = vsel %vm2123_vm6, 1.0, %v3013_v22 }
0x1c58   :  { %v2125_v56 = vpack.c.bf16 %v2124_v53, %v2124_v53 }
0x1c59   :  { %2850 = vtanh.f32 %v2006_v1  ;;  %v2007_v20 = vmul.f32 0.7978846, %v2005_v6 }
0x1c5b   :  { %2852 = vtanh.f32 %v2007_v20 }
0x1c63   :  { %v2851_v58 = vpop.eup %2850 }
0x1c64   :  { %v2010_v3 = vadd.f32 1.0, %v2851_v58 }
0x1c65   :  { %v2853_v29 = vpop.eup %2852 }
0x1c66   :  { %v2011_v12 = vadd.f32 1.0, %v2853_v29  ;;  %v2012_v57 = vmul.f32 %v2010_v3, %v1996_v9 }
0x1c68   :  { %v2013_v13 = vmul.f32 %v2011_v12, %v1997_v10 }
0x1c6a   :  { %v2014_v2 = vpack.c.bf16 %v2013_v13, %v2012_v57 }
0x1c6c   :  { %2695 = vmatmul.mubr.msk.bf16.vlgmr.msra.gmra.mrb[56].mxu0 %vm1025_vm5, %v2014_v2 }
0x1c6d   :  { %2716 = vmatprep.mubr.msk.bf16.mxu0 %vm3014_vm1, %v3013_v22 }
0x1d3f   :  { %v2065_v16 = vpop.f32.mrb[56].mxu0 }
0x1d40   :  { %v2066_v19 = vadd.f32 %v2065_v16, %v2020_v15  ;;  %v2696_v11 = vpop.f32.mrb[57].mxu0 }
0x1d41   :  { %v2068_v14 = vpop.f32.mrb[58].mxu0  ;;  %v2866_v11 = vld [vmem:[%s3663_s5] sm:$0x3]  ;;  %s3026_s5 = smov [#allocation9]  }
0x1d42   :  { %v2069_v27 = vadd.f32 %v2068_v14, %v2020_v15  ;;  %v2697_v30 = vpop.f32.mrb[59].mxu0  ;;  %v2072_v31 = vadd.f32 %v2066_v19, %v1937_v41 }
0x1d44   :  { %v2074_v42 = vsel %vm76_vm0, %v2072_v31, 0.0  ;;  %v2073_v21 = vadd.f32 %v2069_v27, %v1938_v43  ;;  %v2311_v27 = vld [vmem:[%s3664_s6] sm:$0x3]  ;;  %s2351_s6 = sshll.u32 %s3026_s5, 4  ;;  %s2352_s6 = int_to_ptr.vmem [resolvable:$true] %s2351_s6 }
0x1d45   :  { %2075 = vadd.xlane.f32.xlu1 %v2074_v42  ;;  %s2933_s2 = scalar_lea.vmem %s2352_s6, 32  ;;  %p2938_p11 = scmp.lt.s32.totalorder %s2352_s6, %s2352_s6 }
0x1d46   :  { %v2077_v25 = vsel %vm76_vm0, %v2073_v21, 0.0  ;;  %p2934_p10 = scmp.ne.s32.totalorder %s2352_s6, %s2933_s2  ;;  %p2939_p12 = scmp.lt.s32.totalorder %s2933_s2, %s2933_s2 }
0x1d47   :  { %2078 = vadd.xlane.f32.xlu0 %v2077_v25 }
0x1d48   :  { %p2940_p13 = por %p2939_p12, %p2938_p11 }
0x1d4a   :  { %p2941_p0 = pnand %p2940_p13, %p2934_p10 }
0x1d56   :  { %2101 = vrot.lane.b32.xlu1 %v1943_v46, %s3018_s16 }
0x1d5a   :  { %2183 = vrot.lane.b32.xlu1 %v3143_v8, %s3018_s16 }
0x1d5e   :  { %2241 = vrot.lane.b32.xlu1 %v2760_v36, %s3012_s4 }
0x1d62   :  { %2243 = vrot.lane.b32.xlu1 %v2764_v5, %s3012_s4 }
0x1d66   :  { %2247 = vrot.lane.b32.xlu1 %v2765_v59, %s3012_s4 }
0x1dd2   :  { %v2076_v32 = vpop.xlane.xlu1 %2075 }
0x1dd3   :  { %v2080_v61 = vmul.f32 0.03125, %v2076_v32 }
0x1dd4   :  { %v2079_v33 = vpop.xlane.xlu0 %2078 }
0x1dd5   :  { %v2082_v18 = vsub.f32 %v2072_v31, %v2080_v61  ;;  %v2081_v26 = vmul.f32 0.03125, %v2079_v33 }
0x1dd6   :  { %v2102_v44 = vpop.permute.xlu1 %2101 }
0x1dd7   :  { %v2083_v34 = vsub.f32 %v2073_v21, %v2081_v26  ;;  %v2084_v24 = vmul.f32 %v2082_v18, %v2082_v18 }
0x1dd9   :  { %v2086_v60 = vsel %vm76_vm0, %v2084_v24, 0.0  ;;  %v2085_v28 = vmul.f32 %v2083_v34, %v2083_v34 }
0x1dda   :  { %2087 = vadd.xlane.f32.xlu0 %v2086_v60  ;;  %v2184_v6 = vpop.permute.xlu1 %2183 }
0x1ddb   :  { %v2089_v7 = vsel %vm76_vm0, %v2085_v28, 0.0 }
0x1dde   :  { %2090 = vadd.xlane.f32.xlu0 %v2089_v7  ;;  %v2242_v20 = vpop.permute.xlu1 %2241 }
0x1de2   :  { %v2244_v58 = vpop.permute.xlu1 %2243 }
0x1de3   :  { %v2250_v3 = vsel %vm2249_vm7, %v2242_v20, %v2244_v58 }
0x1de4   :  { %2713 = vmatpush3.bf16.msra.mxu0 %v2250_v3 }
0x1de5   :  { %2714 = vmatprep.subr.bf16.mxu0 %v3013_v22 }
0x1de6   :  { %v2248_v29 = vpop.permute.xlu1 %2247 }
0x1df4   :  { %2106 = vrot.lane.b32.xlu0 %v1943_v46, %s3019_s17 }
0x1df8   :  { %2245 = vrot.lane.b32.xlu0 %v2762_v4, %s3012_s4 }
0x1e67   :  { %v2088_v8 = vpop.xlane.xlu0 %2087 }
0x1e68   :  { %v2092_v37 = vmul.f32 0.03125, %v2088_v8 }
0x1e6a   :  { %v2094_v39 = vadd.f32 1e-12, %v2092_v37 }
0x1e6b   :  { %v2091_v50 = vpop.xlane.xlu0 %2090 }
0x1e6c   :  { %2854 = vrsqrt.f32 %v2094_v39  ;;  %v2093_v63 = vmul.f32 0.03125, %v2091_v50 }
0x1e6e   :  { %v2095_v41 = vadd.f32 1e-12, %v2093_v63 }
0x1e6f   :  { %v2107_v38 = vpop.permute.xlu0 %2106 }
0x1e70   :  { %2856 = vrsqrt.f32 %v2095_v41 }
0x1e73   :  { %v2246_v9 = vpop.permute.xlu0 %2245 }
0x1e74   :  { %v2251_v10 = vsel %vm2249_vm7, %v2246_v9, %v2248_v29 }
0x1e75   :  { %2715 = vmatpush3.bf16.msra.mxu0 %v2251_v10 }
0x1e76   :  { %v2855_v43 = vpop.eup %2854 }
0x1e77   :  { %v2098_v45 = vmul.f32 %v2855_v43, %v2082_v18 }
0x1e79   :  { %v2104_v46 = vmul.f32 %v2102_v44, %v2098_v45 }
0x1e7a   :  { %v2857_v47 = vpop.eup %2856 }
0x1e7b   :  { %v2099_v48 = vmul.f32 %v2857_v47, %v2083_v34  ;;  %v2109_v49 = vadd.f32 %v2107_v38, %v2104_v46 }
0x1e7d   :  { %v2105_v51 = vmul.f32 %v2102_v44, %v2099_v48  ;;  %2112 = vst.msk [vmem:[#allocation8 + $0x20] sm:$0xff] %vm76_vm0, %v2109_v49 }
0x1e7f   :  { %v2110_v52 = vadd.f32 %v2107_v38, %v2105_v51 }
0x1e81   :  { %2113 = vst.msk [vmem:[#allocation8 + $0x28] sm:$0xff] %vm76_vm0, %v2110_v52  ;;  %v2126_v55 = vpack.c.bf16 %v2110_v52, %v2109_v49 }
0x1e83   :  { %2699 = vmatpush3.bf16.msra.mxu1 %v2126_v55 }
0x1e84   :  { %2704 = vmatprep.subr.bf16.mxu1 %v3013_v22 }
0x1e86   :  { %2701 = vmatmul.mubr.msk.bf16.vlgmr.msra.gmra.mrb[60].mxu1 %vm242_vm3, %v2125_v56 }
0x1e87   :  { %2705 = vmatpush3.bf16.msra.mxu1 %v2760_v36  ;;  %2708 = vmatprep.mubr.msk.bf16.mxu1 %vm3014_vm1, %v3013_v22 }
0x1e88   :  { %2706 = vmatprep.subr.bf16.mxu1 %v3013_v22  ;;  %v2234_v22 = vrot.slane %v2866_v11, %v3334_v17 }
0x1e8b   :  { %2707 = vmatpush3.bf16.msra.mxu1 %v2762_v4 }
0x1f59   :  { %v2164_v23 = vpop.f32.mrb[60].mxu1 }
0x1f5a   :  { %v2170_v62 = vpack.c.bf16 %v2164_v23, %v2164_v23  ;;  %v2702_v0 = vpop.f32.mrb[61].mxu1 }
0x1f5b   :  { %v2167_v54 = vpop.f32.mrb[62].mxu1 }
0x1f5c   :  { %2709 = vmatmul.mubr.msk.bf16.vlgmr.msra.gmra.mrb[64].mxu1 %vm76_vm0, %v2170_v62  ;;  %v2703_v1 = vpop.f32.mrb[63].mxu1 }
0x202f   :  { %v2223_v12 = vpop.f32.mrb[64].mxu1 }
0x2030   :  { %v2224_v57 = vadd.f32 %v2223_v12, %v2184_v6  ;;  %v2710_v13 = vpop.f32.mrb[65].mxu1 }
0x2031   :  { %v2226_v2 = vpop.f32.mrb[66].mxu1 }
0x2032   :  { %2858 = vtanh.f32 %v2224_v57  ;;  %v2711_v15 = vpop.f32.mrb[67].mxu1 }
0x203c   :  { %v2859_v16 = vpop.eup %2858 }
0x203d   :  { %v2230_v19 = vpack.c.bf16 %v2859_v16, %v2859_v16 }
0x203f   :  { %2717 = vmatmul.mubr.msk.bf16.vlgmr.msra.gmra.mrb[60].mxu0 %vm76_vm0, %v2230_v19 }
0x2112   :  { %v2291_v14 = vpop.f32.mrb[60].mxu0 }
0x2113   :  { %v2292_v30 = vadd.f32 %v2291_v14, %v2234_v22  ;;  %v2718_v31 = vpop.f32.mrb[61].mxu0 }
0x2114   :  { %v2294_v42 = vpop.f32.mrb[62].mxu0 }
0x2115   :  { %2297 = vst [vmem:[#allocation9] sm:$0x3] %v2292_v30  ;;  %v2719_v21 = vpop.f32.mrb[63].mxu0  ;;  %v2299_v25 = vsel %vm2298_vm8, %v2292_v30, -inf  ;;  %v2312_v32 = vmul.f32 %v2311_v27, %v2292_v30 }
0x2116   :  { %2300 = vmax.xlane.f32.xlu0 %v2299_v25 }
0x2117   :  { %v2313_v61 = vsel %vm2298_vm8, %v2312_v32, 0.0 }
0x211a   :  { %2314 = vadd.xlane.f32.xlu0 %v2313_v61 }
0x21a3   :  { %v2301_v33 = vpop.xlane.xlu0 %2300 }
0x21a4   :  { %v2302_v17 = vsub.f32 %v2292_v30, %v2301_v33 }
0x21a6   :  { %v2303_v18 = vmul.f32 1.442695, %v2302_v17 }
0x21a7   :  { %v2315_v36 = vpop.xlane.xlu0 %2314 }
0x21a8   :  { %2860 = vpow2.f32 %v2303_v18 }
0x21b2   :  { %v2861_v26 = vpop.eup %2860 }
0x21b3   :  { %v2305_v34 = vsel %vm2298_vm8, %v2861_v26, 0.0 }
0x21b4   :  { %2306 = vadd.xlane.f32.xlu1 %v2305_v34 }
0x2241   :  { %v2307_v24 = vpop.xlane.xlu1 %2306 }
0x2242   :  { %2862 = vlog2.f32 %v2307_v24 }
0x224c   :  { %v2863_v60 = vpop.eup %2862 }
0x224d   :  { %v2309_v28 = vmul.f32 0.6931472, %v2863_v60 }
0x224f   :  { %v2310_v7 = vadd.f32 %v2309_v28, %v2301_v33 }
0x2251   :  { %v2316_v8 = vsub.f32 %v2310_v7, %v2315_v36 }
0x2253   :  { %v2318_v37 = vsel %vm2317_vm9, %v2316_v8, 0.0 }
0x2254   :  { %2319 = vadd.xlane.f32.xlu0 %v2318_v37 }
0x2255   :  { %2944 = shalt.err (!%p2941_p0)
}
0x2256   :  { %s2945_s15 = scalar_lea.hbm %s3666_s8, 32 }
0x2257   :  { %p2946_p1 = scmp.ne.s32.totalorder %s3666_s8, %s2945_s15  ;;  %p2949_p2 = scmp.lt.u32.totalorder %s2945_s15, %s3666_s8 }
0x2259   :  { %p2951_p3 = pnand %p2949_p2, %p2946_p1 }
0x225b   :  { %2954 = shalt.err (!%p2951_p3)
}
0x225c   :  { %2354 = dma.vmem_to_hbm [thread:$0]  %s2352_s6, 32, %s3666_s8, [#allocation10]  }
0x225d   :  { %s2955_s24 = scalar_lea.vmem %s3612_s13, 768  ;;  %p2960_p5 = scmp.lt.s32.totalorder %s3612_s13, %s3612_s13 }
0x225e   :  { %p2956_p4 = scmp.ne.s32.totalorder %s3612_s13, %s2955_s24  ;;  %p2961_p6 = scmp.lt.s32.totalorder %s2955_s24, %s2955_s24 }
0x2260   :  { %p2962_p7 = por %p2961_p6, %p2960_p5 }
0x2262   :  { %p2963_p8 = pnand %p2962_p7, %p2956_p4 }
0x2264   :  { %2966 = shalt.err (!%p2963_p8)
}
0x2265   :  { %s2967_s12 = scalar_lea.hbm %s3665_s7, 768 }
0x2266   :  { %p2968_p9 = scmp.ne.s32.totalorder %s3665_s7, %s2967_s12  ;;  %p2971_p10 = scmp.lt.u32.totalorder %s2967_s12, %s3665_s7 }
0x2268   :  { %p2973_p11 = pnand %p2971_p10, %p2968_p9 }
0x226a   :  { %2976 = shalt.err (!%p2973_p11)
}
0x226b   :  { %2344 = dma.vmem_to_hbm [thread:$0]  %s3612_s13, 768, %s3665_s7, [#allocation4], %s3009_s21, %s3009_s21, %s3010_s22   ;;  %vm2331_vm10 = vcmask 0  }
0x226c   :  { %s3028_s4 = smov [#allocation11]  }
0x226d   :  { %s2361_s29 = sshll.u32 %s3028_s4, 4  ;;  %s2362_s29 = int_to_ptr.vmem [resolvable:$true] %s2361_s29 }
0x226e   :  { %s2977_s5 = scalar_lea.vmem %s2362_s29, 16  ;;  %s2981_s6 = scalar_lea.vmem %s2362_s29, 32 }
0x226f   :  { %p2978_p12 = scmp.ne.s32.totalorder %s2362_s29, %s2977_s5  ;;  %p2982_p13 = scmp.lt.s32.totalorder %s2362_s29, %s2362_s29 }
0x2270   :  { %p2983_p0 = scmp.lt.s32.totalorder %s2981_s6, %s2977_s5 }
0x2272   :  { %p2984_p1 = por %p2983_p0, %p2982_p13 }
0x2274   :  { %p2985_p2 = pnand %p2984_p1, %p2978_p12 }
0x22e1   :  { %v2320_v39 = vpop.xlane.xlu0 %2319 }
0x22e2   :  { %v2321_v50 = vrot.slane %v2320_v39, 4 }
0x22e4   :  { %v2322_v63 = vadd.f32 %v2321_v50, %v2320_v39 }
0x22e6   :  { %v2323_v41 = vrot.slane %v2322_v63, 2 }
0x22e8   :  { %v2324_v43 = vadd.f32 %v2323_v41, %v2322_v63 }
0x22ea   :  { %v2325_v44 = vrot.slane %v2324_v43, 1 }
0x22ec   :  { %v2326_v45 = vadd.f32 %v2325_v44, %v2324_v43 }
0x22ee   :  { %2720 = vpush %v2326_v45 }
0x231f   :  { %s2721_s30 = spop %2720 }
0x2320   :  { %v2328_v38 = vstv %s2721_s30 }
0x2321   :  { %v2330_v35 = vmul.f32 0.5, %v2328_v38 }
0x2323   :  { %2332 = vst.msk [vmem:[#allocation11] sm:$0x1] %vm2331_vm10, %v2330_v35 }
0x2324   :  { %2988 = shalt.err (!%p2985_p2)
}
0x2325   :  { %s2989_s22 = scalar_lea.hbm %s3667_s9, 16 }
0x2326   :  { %p2990_p3 = scmp.ne.s32.totalorder %s3667_s9, %s2989_s22  ;;  %p2993_p4 = scmp.lt.u32.totalorder %s2989_s22, %s3667_s9 }
0x2328   :  { %p2995_p5 = pnand %p2993_p4, %p2990_p3 }
0x232a   :  { %2998 = shalt.err (!%p2995_p5)
}
0x232b   :  { %2364 = dma.vmem_to_hbm [thread:$0]  %s2362_s29, 16, %s3667_s9, [#allocation10]  }
0x232c   :  { %3003 = dma.done.wait [#allocation4], 768  }
0x232d   :  { %3004 = vsyncadd [#allocation4], 4294966528 }
0x232e   :  { %3005 = dma.done.wait [#allocation10], 48  }
0x232f   :  { %3006 = vsyncadd [#allocation10], 4294967248 }
0x2330   :  { %2374 = vsyncpa [#allocation3], 1 }
0x2331   :  { %2375 = vsyncpa [#allocation6], 1 }
0x2332   :  { %2376 = vsyncpa [#allocation4], 1 }
0x2333   :  { %2377 = vsyncpa [#allocation10], 1 }

</bundles_post_ra>
